<compile_context>
chip_gen: v6e
topology: v6e:2x2x1
jax: 0.10.0
libtpu: 0.0.40
codegen_flags: <defaults>
</compile_context>

<pallas_src>
import jax
import jax.numpy as jnp
from jax import lax
from jax.experimental import pallas as pl
from jax.experimental.pallas import tpu as pltpu


# ---------- Mosaic-safe elementwise helpers ----------

def _sigmoid(x):
    # 1 / (1 + exp(-x)); divide goes to the EUP via the approximate reciprocal.
    return pl.reciprocal(1.0 + jnp.exp(-x), approx=True)


def _silu(x):
    return x * _sigmoid(x)


def _softplus(x):
    return jnp.maximum(x, 0.0) + jnp.log(1.0 + jnp.exp(-jnp.abs(x)))


def _erf(x):
    # Abramowitz & Stegun 7.1.26 polynomial, |err| < 1.5e-7 (keeps nn.GELU() exact-erf semantics).
    a1, a2, a3, a4, a5 = 0.254829592, -0.284496736, 1.421413741, -1.453152027, 1.061405429
    p = 0.3275911
    s = jnp.where(x >= 0.0, 1.0, -1.0)
    ax = jnp.abs(x)
    t = 1.0 / (1.0 + p * ax)
    poly = ((((a5 * t + a4) * t + a3) * t + a2) * t + a1) * t
    return s * (1.0 - poly * jnp.exp(-ax * ax))


def _gelu_exact(x):
    return 0.5 * x * (1.0 + _erf(x * 0.7071067811865476))


# ---------- Pallas kernel: one (TB sequences) x (TL timesteps) tile per grid step ----------

def _mamba_block_kernel(
    x_ref,        # (TB, TL, D)   f32 input tile
    lnw_ref,      # (1, D)        LayerNorm weight
    lnb_ref,      # (1, D)        LayerNorm bias
    w_in_ref,     # (D, 2*Di)     in_proj.weight^T   (bf16)
    convw_ref,    # (K, Di)       depthwise conv weight (tap-major)
    convb_ref,    # (1, Di)       conv bias
    w_xp_ref,     # (Di, XPpad)   x_proj.weight^T    (bf16, zero-padded to 128-lane multiple)
    w_dt_ref,     # (R, Di)       dt_proj.weight^T
    b_dt_ref,     # (1, Di)       dt_proj.bias
    a_t_ref,      # (N, Di)       A_log^T
    d_ref,        # (1, Di)       D skip parameter
    w_out_ref,    # (Di, D)       out_proj.weight^T  (bf16)
    w_glu_ref,    # (D, 2*D)      GLU linear weight^T (bf16)
    b_glu_ref,    # (1, 2*D)      GLU linear bias
    o_ref,        # (TB, TL, D)   f32 output tile
    h_ref,        # scratch (1, TB*N*Di)    scan carry across time tiles
    tail_ref,     # scratch (TB*(K-1), Di)  conv carry (last K-1 u rows per sequence)
):
    j = pl.program_id(1)
    TB, TL, D = x_ref.shape
    Di = d_ref.shape[1]
    N = a_t_ref.shape[0]
    R = w_dt_ref.shape[0]
    K = convw_ref.shape[0]
    Km1 = K - 1
    W = TB * N * Di                       # lane width of the interleaved scan state
    CHUNK = 8 if TL % 8 == 0 else 1
    n_chunks = TL // CHUNK
    rows = TB * TL

    # ---- reset carried state at the first time tile of every sequence block ----
    @pl.when(j == 0)
    def _():
        h_ref[...] = jnp.zeros_like(h_ref)
        tail_ref[...] = jnp.zeros_like(tail_ref)

    # fold the TB sequences of this block into rows (row = tb*TL + t)
    x = jnp.concatenate([x_ref[tb] for tb in range(TB)], axis=0)       # (rows, D)
    skip = x

    # ---- prenorm LayerNorm over the hidden dim ----
    mu = jnp.mean(x, axis=-1, keepdims=True)
    xm = x - mu
    var = jnp.mean(xm * xm, axis=-1, keepdims=True)
    xn = (xm * lax.rsqrt(var + 1e-5)) * lnw_ref[...] + lnb_ref[...]

    # ---- in_proj -> (u, z)  (bf16 MXU, f32 accumulate) ----
    xz = jnp.dot(xn.astype(jnp.bfloat16), w_in_ref[...],
                 preferred_element_type=jnp.float32)                   # (rows, 2*Di)
    u = xz[:, :Di]
    z = xz[:, Di:]

    # ---- causal depthwise conv along time with a carried (K-1)-row tail per sequence ----
    conv_w = convw_ref[...]                                            # (K, Di)
    conv_parts = []
    for tb in range(TB):                                               # TB is static
        u_tb = u[tb * TL:(tb + 1) * TL, :]                             # (TL, Di)
        tail_tb = tail_ref[tb * Km1:(tb + 1) * Km1, :]                 # (K-1, Di)
        u_ext = jnp.concatenate([tail_tb, u_tb], axis=0)               # (TL+K-1, Di)
        acc = u_ext[Km1:Km1 + TL, :] * conv_w[Km1:K, :]
        for k in range(Km1):
            acc = acc + u_ext[k:k + TL, :] * conv_w[k:k + 1, :]
        conv_parts.append(acc)
        # carry the last K-1 pre-activation rows of u into the next time tile
        tail_ref[tb * Km1:(tb + 1) * Km1, :] = u_ext[TL:TL + Km1, :]
    u_c = _silu(jnp.concatenate(conv_parts, axis=0) + convb_ref[...])  # (rows, Di)

    # ---- x_proj -> (dt_low | B | C)  (MXU output width padded to 128 lanes) ----
    xdbl = jnp.dot(u_c.astype(jnp.bfloat16), w_xp_ref[...],
                   preferred_element_type=jnp.float32)                 # (rows, XPpad)
    if R >= 64:
        dt = jnp.dot(xdbl[:, :R], w_dt_ref[...],
                     preferred_element_type=jnp.float32) + b_dt_ref[...]
    else:
        # contraction depth R is tiny -> R broadcast FMAs on the VPU, no MXU bubble
        dt = xdbl[:, 0:1] * w_dt_ref[0:1, :] + b_dt_ref[...]
        for r in range(1, R):
            dt = dt + xdbl[:, r:r + 1] * w_dt_ref[r:r + 1, :]
    dt = _softplus(dt)                                                 # (rows, Di)
    Bm = xdbl[:, R:R + N]                                              # (rows, N)
    Cm = xdbl[:, R + N:R + 2 * N]                                      # (rows, N)

    At = -jnp.exp(a_t_ref[...])                                        # (N, Di)
    dtu = dt * u_c                                                     # (rows, Di)

    # ---- selective scan: TB sequences interleaved on lanes, chunkwise log-step scan ----
    h = h_ref[...]                                                     # (1, W) carry
    y_parts = [[] for _ in range(TB)]
    for c in range(n_chunks):                                          # static within a tile
        t0 = c * CHUNK
        a_cols, b_cols, c_chunk = [], [], []
        for tb in range(TB):
            r0 = tb * TL + t0
            dt_c = dt[r0:r0 + CHUNK, :]                                # (CHUNK, Di)
            dtu_c = dtu[r0:r0 + CHUNK, :]
            B_c = Bm[r0:r0 + CHUNK, :]                                 # (CHUNK, N)
            c_chunk.append(Cm[r0:r0 + CHUNK, :])                       # (CHUNK, N)
            for n in range(N):
                a_cols.append(jnp.exp(dt_c * At[n:n + 1, :]))          # dA  (CHUNK, Di)
                b_cols.append(B_c[:, n:n + 1] * dtu_c)                 # dBu (CHUNK, Di)
        Ac = jnp.concatenate(a_cols, axis=1)                           # (CHUNK, W)
        Bc = jnp.concatenate(b_cols, axis=1)                           # (CHUNK, W)

        # Hillis-Steele inclusive scan of the affine maps h -> a*h + b over the chunk rows:
        # after log2(CHUNK) full-tile passes, row t composes steps t0..t0+t, so the only
        # serial dependence on the cross-chunk carry is ONE fused multiply-add.
        for o in (1, 2, 4):
            if o < CHUNK:
                a_prev = jnp.concatenate(
                    [jnp.ones((o, W), jnp.float32), Ac[:CHUNK - o, :]], axis=0)
                b_prev = jnp.concatenate(
                    [jnp.zeros((o, W), jnp.float32), Bc[:CHUNK - o, :]], axis=0)
                Bc = Ac * b_prev + Bc
                Ac = Ac * a_prev
        h_chunk = Ac * h + Bc                                          # (CHUNK, W)
        h = h_chunk[CHUNK - 1:CHUNK, :]                                # new carry

        # fused y_t = C_t . h_t  (no state-history scratch leaves the chunk)
        for tb in range(TB):
            off = tb * N * Di
            yb = h_chunk[:, off:off + Di] * c_chunk[tb][:, 0:1]
            for n in range(1, N):
                yb = yb + (h_chunk[:, off + n * Di:off + (n + 1) * Di]
                           * c_chunk[tb][:, n:n + 1])
            y_parts[tb].append(yb)                                     # (CHUNK, Di)
    h_ref[...] = h                                                     # carry to next time tile

    y = jnp.concatenate([jnp.concatenate(p, axis=0) for p in y_parts], axis=0)  # (rows, Di)

    # ---- D skip, gate by SiLU(z), out_proj (bf16 MXU) ----
    y = y + d_ref[...] * u_c
    y = y * _silu(z)
    out = jnp.dot(y.astype(jnp.bfloat16), w_out_ref[...],
                  preferred_element_type=jnp.float32)                  # (rows, D)

    # ---- MambaBlock tail: GELU -> (dropout=id) -> GLU -> (dropout=id) -> +skip ----
    out = _gelu_exact(out)
    g = jnp.dot(out.astype(jnp.bfloat16), w_glu_ref[...],
                preferred_element_type=jnp.float32) + b_glu_ref[...]   # (rows, 2D)
    out = g[:, :D] * _sigmoid(g[:, D:])
    res = out + skip
    for tb in range(TB):
        o_ref[tb] = res[tb * TL:(tb + 1) * TL, :]


# ---------- wrapper ----------

def mamba_block_forward(x, kp, *, seqs_per_block=None, time_block=None):
    B, L, D = x.shape
    Di = kp["d"].shape[1]
    N = kp["a_log_t"].shape[0]
    R = kp["w_dt_t"].shape[0]
    K = kp["conv_w"].shape[0]

    TB = seqs_per_block if seqs_per_block is not None else min(B, 4)
    while B % TB:
        TB -= 1
    if time_block is not None:
        TL = time_block
    else:
        TL = L
        for cand in (256, 128, 64, 32, 16, 8):
            if L % cand == 0:
                TL = cand
                break
    assert B % TB == 0 and L % TL == 0
    assert TL % 8 == 0 or TB == 1, "time tile must be a multiple of 8 when TB > 1"
    assert TL >= K - 1, "time tile must cover the conv receptive-field carry"

    f32, bf16 = jnp.float32, jnp.bfloat16

    # pad x_proj output width to a multiple of 128 lanes (zero columns -> identical result)
    XP = R + 2 * N
    XPpad = ((XP + 127) // 128) * 128
    w_xp_pad = jnp.zeros((Di, XPpad), bf16).at[:, :XP].set(kp["w_xp_t"].astype(bf16))

    params = [
        kp["ln_w"].astype(f32), kp["ln_b"].astype(f32),
        kp["w_in_t"].astype(bf16),
        kp["conv_w"].astype(f32), kp["conv_b"].astype(f32),
        w_xp_pad,
        kp["w_dt_t"].astype(f32), kp["b_dt"].astype(f32),
        kp["a_log_t"].astype(f32), kp["d"].astype(f32),
        kp["w_out_t"].astype(bf16),
        kp["w_glu_t"].astype(bf16), kp["b_glu"].astype(f32),
    ]

    def _const_map(i, j):
        return (0, 0)

    in_specs = [pl.BlockSpec((TB, TL, D), lambda i, j: (i, j, 0))]
    in_specs += [pl.BlockSpec(p.shape, _const_map) for p in params]
    out_specs = pl.BlockSpec((TB, TL, D), lambda i, j: (i, j, 0))

    grid_spec = pltpu.PrefetchScalarGridSpec(
        num_scalar_prefetch=0,
        grid=(B // TB, L // TL),
        in_specs=in_specs,
        out_specs=out_specs,
        scratch_shapes=[
            pltpu.VMEM((1, TB * N * Di), f32),        # scan state carried across time tiles
            pltpu.VMEM((TB * (K - 1), Di), f32),      # depthwise-conv tail carry
        ],
    )

    # per-chip VMEM budget: ~96 MiB on v5e/v6e (128 MiB phys), ~48 MiB on v7x (64 MiB phys)
    try:
        info = pltpu.get_tpu_info()
        vmem_cap = getattr(info, "vmem_capacity_bytes", 128 * 1024 * 1024)
    except Exception:  # pragma: no cover - conservative fallback
        vmem_cap = 128 * 1024 * 1024
    vmem_limit = min(100 * 1024 * 1024, int(vmem_cap * 3 // 4))

    y = pl.pallas_call(
        _mamba_block_kernel,
        out_shape=jax.ShapeDtypeStruct((B, L, D), f32),
        grid_spec=grid_spec,
        compiler_params=pltpu.CompilerParams(
            # batch axis -> megacore-parallel (v7x); time axis carries state -> arbitrary
            dimension_semantics=("parallel", "arbitrary"),
            vmem_limit_bytes=vmem_limit,
        ),
    )(x.astype(f32), *params)
    return y


# ---------- pure-JAX reference (matched dtype policy: bf16 matmuls, f32 math) ----------

def mamba_block_reference(x, kp):
    f32, bf16 = jnp.float32, jnp.bfloat16
    B, L, D = x.shape
    Di = kp["d"].shape[1]
    N = kp["a_log_t"].shape[0]
    R = kp["w_dt_t"].shape[0]
    K = kp["conv_w"].shape[0]

    def mm(a, w):
        return jnp.dot(a.astype(bf16), w.astype(bf16), preferred_element_type=f32)

    skip = x
    mu = jnp.mean(x, -1, keepdims=True)
    var = jnp.mean((x - mu) ** 2, -1, keepdims=True)
    xn = (x - mu) * lax.rsqrt(var + 1e-5) * kp["ln_w"][0] + kp["ln_b"][0]

    xz = mm(xn.reshape(B * L, D), kp["w_in_t"]).reshape(B, L, 2 * Di)
    u, z = xz[..., :Di], xz[..., Di:]

    w = kp["conv_w"]                                   # (K, Di)
    u_pad = jnp.pad(u, ((0, 0), (K - 1, 0), (0, 0)))
    conv = sum(u_pad[:, k:k + L, :] * w[k] for k in range(K)) + kp["conv_b"][0]
    u_c = conv * jax.nn.sigmoid(conv)

    xdbl = mm(u_c.reshape(B * L, Di), kp["w_xp_t"]).reshape(B, L, R + 2 * N)
    dt = jax.nn.softplus(jnp.dot(xdbl[..., :R], kp["w_dt_t"]) + kp["b_dt"][0])
    Bm = xdbl[..., R:R + N]
    Cm = xdbl[..., R + N:]

    A = -jnp.exp(kp["a_log_t"])                        # (N, Di)
    dA = jnp.exp(dt[:, :, None, :] * A[None, None])    # (B, L, N, Di)
    dBu = Bm[..., None] * (dt * u_c)[:, :, None, :]    # (B, L, N, Di)

    def step(h, ab):
        a, b = ab
        h = a * h + b
        return h, h

    _, hs = lax.scan(step, jnp.zeros((B, N, Di), f32),
                     (jnp.moveaxis(dA, 1, 0), jnp.moveaxis(dBu, 1, 0)))
    hs = jnp.moveaxis(hs, 0, 1)                        # (B, L, N, Di)
    y = jnp.einsum("blnd,bln->bld", hs, Cm) + kp["d"][0] * u_c
    y = y * (z * jax.nn.sigmoid(z))

    out = mm(y.reshape(B * L, Di), kp["w_out_t"]).reshape(B, L, D)
    out = 0.5 * out * (1.0 + lax.erf(out * (2.0 ** -0.5)))
    g = mm(out.reshape(B * L, D), kp["w_glu_t"]).reshape(B, L, 2 * D) + kp["b_glu"][0]
    out = g[..., :D] * jax.nn.sigmoid(g[..., D:])
    return out + skip


# ---------- deterministic parameter initialization (module __init__ shapes) ----------

def init_params(key, hidden_dim, state_dim, conv_dim, expansion):
    D, N, K = hidden_dim, state_dim, conv_dim
    Di = expansion * D
    R = -(-D // 16)  # dt_rank = ceil(d_model / 16)
    ks = jax.random.split(key, 9)

    def rnd(k, shape, scale):
        return jax.random.normal(k, shape, dtype=jnp.float32) * scale

    ln_w = jnp.ones((D,), jnp.float32)
    ln_b = jnp.zeros((D,), jnp.float32)
    w_in = rnd(ks[0], (2 * Di, D), D ** -0.5)           # in_proj.weight (bias=False)
    conv_w = rnd(ks[1], (Di, 1, K), K ** -0.5)          # conv1d.weight (depthwise)
    conv_b = rnd(ks[2], (Di,), 0.02)                    # conv1d.bias
    w_xp = rnd(ks[3], (R + 2 * N, Di), Di ** -0.5)      # x_proj.weight (bias=False)
    w_dt = rnd(ks[4], (Di, R), R ** -0.5)               # dt_proj.weight
    dt_init = jnp.exp(jax.random.uniform(ks[5], (Di,), jnp.float32,
                                         jnp.log(1e-3), jnp.log(1e-1)))
    b_dt = jnp.log(jnp.expm1(dt_init))                  # dt_proj.bias (inv-softplus init)
    a_log = jnp.log(jnp.tile(jnp.arange(1, N + 1, dtype=jnp.float32)[None, :], (Di, 1)))
    d_par = jnp.ones((Di,), jnp.float32)                # D
    w_out = rnd(ks[6], (D, Di), Di ** -0.5)             # out_proj.weight (bias=False)
    w_glu = rnd(ks[7], (2 * D, D), D ** -0.5)           # GLU linear.weight
    b_glu = rnd(ks[8], (2 * D,), 0.02)                  # GLU linear.bias

    return dict(
        ln_w=ln_w[None, :], ln_b=ln_b[None, :],
        w_in_t=jnp.transpose(w_in),                     # (D, 2*Di)
        conv_w=jnp.transpose(conv_w[:, 0, :]),          # (K, Di)
        conv_b=conv_b[None, :],
        w_xp_t=jnp.transpose(w_xp),                     # (Di, R+2N)
        w_dt_t=jnp.transpose(w_dt),                     # (R, Di)
        b_dt=b_dt[None, :],
        a_log_t=jnp.transpose(a_log),                   # (N, Di)
        d=d_par[None, :],
        w_out_t=jnp.transpose(w_out),                   # (Di, D)
        w_glu_t=jnp.transpose(w_glu),                   # (D, 2*D)
        b_glu=b_glu[None, :],
    )


if __name__ == "__main__":
    # MambaBlock(hidden_dim=32, state_dim=8, conv_dim=4, expansion=2,
    #            dropout=0.1 (eval -> identity), glu=True, norm='layer', prenorm=True)
    B, L, D = 4, 16, 32
    state_dim, conv_dim, expansion = 8, 4, 2

    key = jax.random.PRNGKey(0)
    k_par, k_x = jax.random.split(key)
    kp = init_params(k_par, D, state_dim, conv_dim, expansion)
    x = jax.random.normal(k_x, (B, L, D), dtype=jnp.float32)

    # 2 sequences per block x 8 timesteps per tile -> grid (2, 2): exercises the parallel batch
    # axis, the carried scan state / conv tail across time tiles, and the interleaved scan.
    y = mamba_block_forward(x, kp, seqs_per_block=2, time_block=8)
    y = jax.block_until_ready(y)

    assert y.shape == (B, L, D)
    assert bool(jnp.all(jnp.isfinite(y)))

    y_ref = mamba_block_reference(x, kp)
    err = float(jnp.max(jnp.abs(y - y_ref)))
    assert err < 5e-2, f"kernel vs reference max abs err {err}"
    print("KERNEL_OK")
</pallas_src>

<mosaic_0001>
module attributes {stable_mosaic.version = 11 : i64} {
  func.func @_mamba_block_kernel(%arg0: i32, %arg1: i32, %arg2: memref<2x8x32xf32, #tpu.memory_space<vmem>>, %arg3: memref<1x32xf32, #tpu.memory_space<vmem>>, %arg4: memref<1x32xf32, #tpu.memory_space<vmem>>, %arg5: memref<32x128xbf16, #tpu.memory_space<vmem>>, %arg6: memref<4x64xf32, #tpu.memory_space<vmem>>, %arg7: memref<1x64xf32, #tpu.memory_space<vmem>>, %arg8: memref<64x128xbf16, #tpu.memory_space<vmem>>, %arg9: memref<2x64xf32, #tpu.memory_space<vmem>>, %arg10: memref<1x64xf32, #tpu.memory_space<vmem>>, %arg11: memref<8x64xf32, #tpu.memory_space<vmem>>, %arg12: memref<1x64xf32, #tpu.memory_space<vmem>>, %arg13: memref<64x32xbf16, #tpu.memory_space<vmem>>, %arg14: memref<32x64xbf16, #tpu.memory_space<vmem>>, %arg15: memref<1x64xf32, #tpu.memory_space<vmem>>, %arg16: memref<2x8x32xf32, #tpu.memory_space<vmem>>, %arg17: memref<1x1024xf32, #tpu.memory_space<vmem>>, %arg18: memref<6x64xf32, #tpu.memory_space<vmem>>) attributes {dimension_semantics = [#tpu.dimension_semantics<parallel>, #tpu.dimension_semantics<arbitrary>], iteration_bounds = array<i64: 2, 2>, scalar_prefetch = 0 : i64, scratch_operands = 2 : i64, tpu.core_type = #tpu.core_type<tc>, window_params = [{transform_indices = @transform_0, window_bounds = array<i64: 2, 8, 32>}, {pipeline_mode = #tpu.pipeline_mode<synchronous>, transform_indices = @transform_1, window_bounds = array<i64: 1, 32>}, {pipeline_mode = #tpu.pipeline_mode<synchronous>, transform_indices = @transform_2, window_bounds = array<i64: 1, 32>}, {pipeline_mode = #tpu.pipeline_mode<synchronous>, transform_indices = @transform_3, window_bounds = array<i64: 32, 128>}, {pipeline_mode = #tpu.pipeline_mode<synchronous>, transform_indices = @transform_4, window_bounds = array<i64: 4, 64>}, {pipeline_mode = #tpu.pipeline_mode<synchronous>, transform_indices = @transform_5, window_bounds = array<i64: 1, 64>}, {pipeline_mode = #tpu.pipeline_mode<synchronous>, transform_indices = @transform_6, window_bounds = array<i64: 64, 128>}, {pipeline_mode = #tpu.pipeline_mode<synchronous>, transform_indices = @transform_7, window_bounds = array<i64: 2, 64>}, {pipeline_mode = #tpu.pipeline_mode<synchronous>, transform_indices = @transform_8, window_bounds = array<i64: 1, 64>}, {pipeline_mode = #tpu.pipeline_mode<synchronous>, transform_indices = @transform_9, window_bounds = array<i64: 8, 64>}, {pipeline_mode = #tpu.pipeline_mode<synchronous>, transform_indices = @transform_10, window_bounds = array<i64: 1, 64>}, {pipeline_mode = #tpu.pipeline_mode<synchronous>, transform_indices = @transform_11, window_bounds = array<i64: 64, 32>}, {pipeline_mode = #tpu.pipeline_mode<synchronous>, transform_indices = @transform_12, window_bounds = array<i64: 32, 64>}, {pipeline_mode = #tpu.pipeline_mode<synchronous>, transform_indices = @transform_13, window_bounds = array<i64: 1, 64>}, {transform_indices = @transform_14, window_bounds = array<i64: 2, 8, 32>}]} {
    %c0_i32 = arith.constant 0 : i32
    %0 = arith.cmpi eq, %arg1, %c0_i32 : i32
    %1 = arith.extui %0 : i1 to i32
    %c0_i32_0 = arith.constant 0 : i32
    %2 = arith.cmpi ne, %1, %c0_i32_0 : i32
    scf.if %2 {
      %cst_90 = arith.constant 0.000000e+00 : f32
      %443 = vector.broadcast %cst_90 : f32 to vector<1x1024xf32>
      %c0_91 = arith.constant 0 : index
      %c0_92 = arith.constant 0 : index
      %444 = vector.load %arg17[%c0_91, %c0_92] : memref<1x1024xf32, #tpu.memory_space<vmem>>, vector<1x1024xf32>
      tpu.vector_store %arg17[%c0_91, %c0_92], %443 {strides = array<i32>} : memref<1x1024xf32, #tpu.memory_space<vmem>>, vector<1x1024xf32>,
      %cst_93 = arith.constant 0.000000e+00 : f32
      %445 = vector.broadcast %cst_93 : f32 to vector<6x64xf32>
      %c0_94 = arith.constant 0 : index
      %c0_95 = arith.constant 0 : index
      %446 = vector.load %arg18[%c0_94, %c0_95] : memref<6x64xf32, #tpu.memory_space<vmem>>, vector<6x64xf32>
      tpu.vector_store %arg18[%c0_94, %c0_95], %445 {strides = array<i32>} : memref<6x64xf32, #tpu.memory_space<vmem>>, vector<6x64xf32>,
    } else {
    }
    %c0 = arith.constant 0 : index
    %c0_1 = arith.constant 0 : index
    %c0_2 = arith.constant 0 : index
    %3 = vector.load %arg2[%c0, %c0_1, %c0_2] : memref<2x8x32xf32, #tpu.memory_space<vmem>>, vector<1x8x32xf32>
    %4 = vector.shape_cast %3 : vector<1x8x32xf32> to vector<8x32xf32>
    %c1 = arith.constant 1 : index
    %c0_3 = arith.constant 0 : index
    %c0_4 = arith.constant 0 : index
    %5 = vector.load %arg2[%c1, %c0_3, %c0_4] : memref<2x8x32xf32, #tpu.memory_space<vmem>>, vector<1x8x32xf32>
    %6 = vector.shape_cast %5 : vector<1x8x32xf32> to vector<8x32xf32>
    %7 = tpu.concatenate %4, %6 in 0 : vector<8x32xf32>, vector<8x32xf32> -> vector<16x32xf32>
    %cst = arith.constant dense<0.000000e+00> : vector<16xf32>
    %8 = vector.multi_reduction <add>, %7, %cst [1] : vector<16x32xf32> to vector<16xf32>
    %9 = vector.shape_cast %8 : vector<16xf32> to vector<16x1xf32>
    %cst_5 = arith.constant 3.200000e+01 : f32
    %10 = vector.broadcast %cst_5 : f32 to vector<16x1xf32>
    %11 = arith.divf %9, %10 : vector<16x1xf32>
    %12 = vector.broadcast %11 : vector<16x1xf32> to vector<16x32xf32>
    %13 = arith.subf %7, %12 : vector<16x32xf32>
    %14 = arith.mulf %13, %13 : vector<16x32xf32>
    %cst_6 = arith.constant dense<0.000000e+00> : vector<16xf32>
    %15 = vector.multi_reduction <add>, %14, %cst_6 [1] : vector<16x32xf32> to vector<16xf32>
    %16 = vector.shape_cast %15 : vector<16xf32> to vector<16x1xf32>
    %cst_7 = arith.constant 3.200000e+01 : f32
    %17 = vector.broadcast %cst_7 : f32 to vector<16x1xf32>
    %18 = arith.divf %16, %17 : vector<16x1xf32>
    %cst_8 = arith.constant 9.99999974E-6 : f32
    %19 = vector.broadcast %cst_8 : f32 to vector<16x1xf32>
    %20 = arith.addf %18, %19 : vector<16x1xf32>
    %21 = math.rsqrt %20 : vector<16x1xf32>
    %22 = vector.broadcast %21 : vector<16x1xf32> to vector<16x32xf32>
    %23 = arith.mulf %13, %22 : vector<16x32xf32>
    %c0_9 = arith.constant 0 : index
    %c0_10 = arith.constant 0 : index
    %24 = vector.load %arg3[%c0_9, %c0_10] : memref<1x32xf32, #tpu.memory_space<vmem>>, vector<1x32xf32>
    %25 = vector.broadcast %24 : vector<1x32xf32> to vector<16x32xf32>
    %26 = arith.mulf %23, %25 : vector<16x32xf32>
    %c0_11 = arith.constant 0 : index
    %c0_12 = arith.constant 0 : index
    %27 = vector.load %arg4[%c0_11, %c0_12] : memref<1x32xf32, #tpu.memory_space<vmem>>, vector<1x32xf32>
    %28 = vector.broadcast %27 : vector<1x32xf32> to vector<16x32xf32>
    %29 = arith.addf %26, %28 : vector<16x32xf32>
    %30 = arith.truncf %29 : vector<16x32xf32> to vector<16x32xbf16>
    %c0_13 = arith.constant 0 : index
    %c0_14 = arith.constant 0 : index
    %31 = vector.load %arg5[%c0_13, %c0_14] : memref<32x128xbf16, #tpu.memory_space<vmem>>, vector<32x128xbf16>
    %cst_15 = arith.constant dense<0.000000e+00> : vector<16x128xf32>
    %32 = tpu.matmul %30, %31, %cst_15 {dimension_numbers = #tpu.dot_dimension_numbers<[1], [0], [0], [1], [0, 0, 1, 1], [], []>} : vector<16x32xbf16>, vector<32x128xbf16>, vector<16x128xf32> -> vector<16x128xf32>
    %33 = vector.extract_strided_slice %32 {offsets = [0, 0], sizes = [16, 64], strides = [1, 1]} : vector<16x128xf32> to vector<16x64xf32>
    %34 = vector.extract_strided_slice %32 {offsets = [0, 64], sizes = [16, 64], strides = [1, 1]} : vector<16x128xf32> to vector<16x64xf32>
    %c0_16 = arith.constant 0 : index
    %c0_17 = arith.constant 0 : index
    %35 = vector.load %arg6[%c0_16, %c0_17] : memref<4x64xf32, #tpu.memory_space<vmem>>, vector<4x64xf32>
    %36 = vector.extract_strided_slice %33 {offsets = [0, 0], sizes = [8, 64], strides = [1, 1]} : vector<16x64xf32> to vector<8x64xf32>
    %c0_18 = arith.constant 0 : index
    %c0_19 = arith.constant 0 : index
    %37 = vector.load %arg18[%c0_18, %c0_19] : memref<6x64xf32, #tpu.memory_space<vmem>>, vector<3x64xf32>
    %38 = tpu.concatenate %37, %36 in 0 : vector<3x64xf32>, vector<8x64xf32> -> vector<11x64xf32>
    %39 = vector.extract_strided_slice %38 {offsets = [3, 0], sizes = [8, 64], strides = [1, 1]} : vector<11x64xf32> to vector<8x64xf32>
    %40 = vector.extract_strided_slice %35 {offsets = [3, 0], sizes = [1, 64], strides = [1, 1]} : vector<4x64xf32> to vector<1x64xf32>
    %41 = vector.broadcast %40 : vector<1x64xf32> to vector<8x64xf32>
    %42 = arith.mulf %39, %41 : vector<8x64xf32>
    %43 = vector.extract_strided_slice %38 {offsets = [0, 0], sizes = [8, 64], strides = [1, 1]} : vector<11x64xf32> to vector<8x64xf32>
    %44 = vector.extract_strided_slice %35 {offsets = [0, 0], sizes = [1, 64], strides = [1, 1]} : vector<4x64xf32> to vector<1x64xf32>
    %45 = vector.broadcast %44 : vector<1x64xf32> to vector<8x64xf32>
    %46 = arith.mulf %43, %45 : vector<8x64xf32>
    %47 = arith.addf %42, %46 : vector<8x64xf32>
    %48 = vector.extract_strided_slice %38 {offsets = [1, 0], sizes = [8, 64], strides = [1, 1]} : vector<11x64xf32> to vector<8x64xf32>
    %49 = vector.extract_strided_slice %35 {offsets = [1, 0], sizes = [1, 64], strides = [1, 1]} : vector<4x64xf32> to vector<1x64xf32>
    %50 = vector.broadcast %49 : vector<1x64xf32> to vector<8x64xf32>
    %51 = arith.mulf %48, %50 : vector<8x64xf32>
    %52 = arith.addf %47, %51 : vector<8x64xf32>
    %53 = vector.extract_strided_slice %38 {offsets = [2, 0], sizes = [8, 64], strides = [1, 1]} : vector<11x64xf32> to vector<8x64xf32>
    %54 = vector.extract_strided_slice %35 {offsets = [2, 0], sizes = [1, 64], strides = [1, 1]} : vector<4x64xf32> to vector<1x64xf32>
    %55 = vector.broadcast %54 : vector<1x64xf32> to vector<8x64xf32>
    %56 = arith.mulf %53, %55 : vector<8x64xf32>
    %57 = arith.addf %52, %56 : vector<8x64xf32>
    %58 = vector.extract_strided_slice %38 {offsets = [8, 0], sizes = [3, 64], strides = [1, 1]} : vector<11x64xf32> to vector<3x64xf32>
    %c0_20 = arith.constant 0 : index
    %c0_21 = arith.constant 0 : index
    %59 = vector.load %arg18[%c0_20, %c0_21] : memref<6x64xf32, #tpu.memory_space<vmem>>, vector<3x64xf32>
    tpu.vector_store %arg18[%c0_20, %c0_21], %58 {strides = array<i32>} : memref<6x64xf32, #tpu.memory_space<vmem>>, vector<3x64xf32>,
    %60 = vector.extract_strided_slice %33 {offsets = [8, 0], sizes = [8, 64], strides = [1, 1]} : vector<16x64xf32> to vector<8x64xf32>
    %c3 = arith.constant 3 : index
    %c0_22 = arith.constant 0 : index
    %61 = vector.load %arg18[%c3, %c0_22] : memref<6x64xf32, #tpu.memory_space<vmem>>, vector<3x64xf32>
    %62 = tpu.concatenate %61, %60 in 0 : vector<3x64xf32>, vector<8x64xf32> -> vector<11x64xf32>
    %63 = vector.extract_strided_slice %62 {offsets = [3, 0], sizes = [8, 64], strides = [1, 1]} : vector<11x64xf32> to vector<8x64xf32>
    %64 = vector.extract_strided_slice %35 {offsets = [3, 0], sizes = [1, 64], strides = [1, 1]} : vector<4x64xf32> to vector<1x64xf32>
    %65 = vector.broadcast %64 : vector<1x64xf32> to vector<8x64xf32>
    %66 = arith.mulf %63, %65 : vector<8x64xf32>
    %67 = vector.extract_strided_slice %62 {offsets = [0, 0], sizes = [8, 64], strides = [1, 1]} : vector<11x64xf32> to vector<8x64xf32>
    %68 = vector.extract_strided_slice %35 {offsets = [0, 0], sizes = [1, 64], strides = [1, 1]} : vector<4x64xf32> to vector<1x64xf32>
    %69 = vector.broadcast %68 : vector<1x64xf32> to vector<8x64xf32>
    %70 = arith.mulf %67, %69 : vector<8x64xf32>
    %71 = arith.addf %66, %70 : vector<8x64xf32>
    %72 = vector.extract_strided_slice %62 {offsets = [1, 0], sizes = [8, 64], strides = [1, 1]} : vector<11x64xf32> to vector<8x64xf32>
    %73 = vector.extract_strided_slice %35 {offsets = [1, 0], sizes = [1, 64], strides = [1, 1]} : vector<4x64xf32> to vector<1x64xf32>
    %74 = vector.broadcast %73 : vector<1x64xf32> to vector<8x64xf32>
    %75 = arith.mulf %72, %74 : vector<8x64xf32>
    %76 = arith.addf %71, %75 : vector<8x64xf32>
    %77 = vector.extract_strided_slice %62 {offsets = [2, 0], sizes = [8, 64], strides = [1, 1]} : vector<11x64xf32> to vector<8x64xf32>
    %78 = vector.extract_strided_slice %35 {offsets = [2, 0], sizes = [1, 64], strides = [1, 1]} : vector<4x64xf32> to vector<1x64xf32>
    %79 = vector.broadcast %78 : vector<1x64xf32> to vector<8x64xf32>
    %80 = arith.mulf %77, %79 : vector<8x64xf32>
    %81 = arith.addf %76, %80 : vector<8x64xf32>
    %82 = vector.extract_strided_slice %62 {offsets = [8, 0], sizes = [3, 64], strides = [1, 1]} : vector<11x64xf32> to vector<3x64xf32>
    %c3_23 = arith.constant 3 : index
    %c0_24 = arith.constant 0 : index
    %83 = vector.load %arg18[%c3_23, %c0_24] : memref<6x64xf32, #tpu.memory_space<vmem>>, vector<3x64xf32>
    tpu.vector_store %arg18[%c3_23, %c0_24], %82 {strides = array<i32>} : memref<6x64xf32, #tpu.memory_space<vmem>>, vector<3x64xf32>,
    %84 = tpu.concatenate %57, %81 in 0 : vector<8x64xf32>, vector<8x64xf32> -> vector<16x64xf32>
    %c0_25 = arith.constant 0 : index
    %c0_26 = arith.constant 0 : index
    %85 = vector.load %arg7[%c0_25, %c0_26] : memref<1x64xf32, #tpu.memory_space<vmem>>, vector<1x64xf32>
    %86 = vector.broadcast %85 : vector<1x64xf32> to vector<16x64xf32>
    %87 = arith.addf %84, %86 : vector<16x64xf32>
    %cst_27 = arith.constant 0.000000e+00 : f32
    %88 = vector.broadcast %cst_27 : f32 to vector<16x64xf32>
    %89 = arith.subf %88, %87 : vector<16x64xf32>
    %90 = math.exp %89 : vector<16x64xf32>
    %cst_28 = arith.constant 1.000000e+00 : f32
    %91 = vector.broadcast %cst_28 : f32 to vector<16x64xf32>
    %92 = arith.addf %91, %90 : vector<16x64xf32>
    %93 = tpu.reciprocal %92 {approx = true} : vector<16x64xf32> -> vector<16x64xf32>
    %94 = arith.mulf %87, %93 : vector<16x64xf32>
    %95 = arith.truncf %94 : vector<16x64xf32> to vector<16x64xbf16>
    %c0_29 = arith.constant 0 : index
    %c0_30 = arith.constant 0 : index
    %96 = vector.load %arg8[%c0_29, %c0_30] : memref<64x128xbf16, #tpu.memory_space<vmem>>, vector<64x128xbf16>
    %cst_31 = arith.constant dense<0.000000e+00> : vector<16x128xf32>
    %97 = tpu.matmul %95, %96, %cst_31 {dimension_numbers = #tpu.dot_dimension_numbers<[1], [0], [0], [1], [0, 0, 1, 1], [], []>} : vector<16x64xbf16>, vector<64x128xbf16>, vector<16x128xf32> -> vector<16x128xf32>
    %98 = vector.extract_strided_slice %97 {offsets = [0, 0], sizes = [16, 1], strides = [1, 1]} : vector<16x128xf32> to vector<16x1xf32>
    %c0_32 = arith.constant 0 : index
    %c0_33 = arith.constant 0 : index
    %99 = vector.load %arg9[%c0_32, %c0_33] : memref<2x64xf32, #tpu.memory_space<vmem>>, vector<1x64xf32>
    %100 = vector.broadcast %98 : vector<16x1xf32> to vector<16x64xf32>
    %101 = vector.broadcast %99 : vector<1x64xf32> to vector<16x64xf32>
    %102 = arith.mulf %100, %101 : vector<16x64xf32>
    %c0_34 = arith.constant 0 : index
    %c0_35 = arith.constant 0 : index
    %103 = vector.load %arg10[%c0_34, %c0_35] : memref<1x64xf32, #tpu.memory_space<vmem>>, vector<1x64xf32>
    %104 = vector.broadcast %103 : vector<1x64xf32> to vector<16x64xf32>
    %105 = arith.addf %102, %104 : vector<16x64xf32>
    %106 = vector.extract_strided_slice %97 {offsets = [0, 1], sizes = [16, 1], strides = [1, 1]} : vector<16x128xf32> to vector<16x1xf32>
    %c1_36 = arith.constant 1 : index
    %c0_37 = arith.constant 0 : index
    %107 = vector.load %arg9[%c1_36, %c0_37] : memref<2x64xf32, #tpu.memory_space<vmem>>, vector<1x64xf32>
    %108 = vector.broadcast %106 : vector<16x1xf32> to vector<16x64xf32>
    %109 = vector.broadcast %107 : vector<1x64xf32> to vector<16x64xf32>
    %110 = arith.mulf %108, %109 : vector<16x64xf32>
    %111 = arith.addf %105, %110 : vector<16x64xf32>
    %cst_38 = arith.constant 0.000000e+00 : f32
    %112 = vector.broadcast %cst_38 : f32 to vector<16x64xf32>
    %113 = arith.maximumf %111, %112 : vector<16x64xf32>
    %114 = math.absf %111 : vector<16x64xf32>
    %cst_39 = arith.constant 0.000000e+00 : f32
    %115 = vector.broadcast %cst_39 : f32 to vector<16x64xf32>
    %116 = arith.subf %115, %114 : vector<16x64xf32>
    %117 = math.exp %116 : vector<16x64xf32>
    %cst_40 = arith.constant 1.000000e+00 : f32
    %118 = vector.broadcast %cst_40 : f32 to vector<16x64xf32>
    %119 = arith.addf %118, %117 : vector<16x64xf32>
    %120 = math.log %119 : vector<16x64xf32>
    %121 = arith.addf %113, %120 : vector<16x64xf32>
    %122 = vector.extract_strided_slice %97 {offsets = [0, 2], sizes = [16, 8], strides = [1, 1]} : vector<16x128xf32> to vector<16x8xf32>
    %123 = vector.extract_strided_slice %97 {offsets = [0, 10], sizes = [16, 8], strides = [1, 1]} : vector<16x128xf32> to vector<16x8xf32>
    %c0_41 = arith.constant 0 : index
    %c0_42 = arith.constant 0 : index
    %124 = vector.load %arg11[%c0_41, %c0_42] : memref<8x64xf32, #tpu.memory_space<vmem>>, vector<8x64xf32>
    %125 = math.exp %124 : vector<8x64xf32>
    %cst_43 = arith.constant 0.000000e+00 : f32
    %126 = vector.broadcast %cst_43 : f32 to vector<8x64xf32>
    %127 = arith.subf %126, %125 : vector<8x64xf32>
    %128 = arith.mulf %121, %94 : vector<16x64xf32>
    %c0_44 = arith.constant 0 : index
    %c0_45 = arith.constant 0 : index
    %129 = vector.load %arg17[%c0_44, %c0_45] : memref<1x1024xf32, #tpu.memory_space<vmem>>, vector<1x1024xf32>
    %130 = vector.extract_strided_slice %121 {offsets = [0, 0], sizes = [8, 64], strides = [1, 1]} : vector<16x64xf32> to vector<8x64xf32>
    %131 = vector.extract_strided_slice %128 {offsets = [0, 0], sizes = [8, 64], strides = [1, 1]} : vector<16x64xf32> to vector<8x64xf32>
    %132 = vector.extract_strided_slice %122 {offsets = [0, 0], sizes = [8, 8], strides = [1, 1]} : vector<16x8xf32> to vector<8x8xf32>
    %133 = vector.extract_strided_slice %123 {offsets = [0, 0], sizes = [8, 8], strides = [1, 1]} : vector<16x8xf32> to vector<8x8xf32>
    %134 = vector.extract_strided_slice %127 {offsets = [0, 0], sizes = [1, 64], strides = [1, 1]} : vector<8x64xf32> to vector<1x64xf32>
    %135 = vector.broadcast %134 : vector<1x64xf32> to vector<8x64xf32>
    %136 = arith.mulf %130, %135 : vector<8x64xf32>
    %137 = math.exp %136 : vector<8x64xf32>
    %138 = vector.extract_strided_slice %132 {offsets = [0, 0], sizes = [8, 1], strides = [1, 1]} : vector<8x8xf32> to vector<8x1xf32>
    %139 = vector.broadcast %138 : vector<8x1xf32> to vector<8x64xf32>
    %140 = arith.mulf %139, %131 : vector<8x64xf32>
    %141 = vector.extract_strided_slice %127 {offsets = [1, 0], sizes = [1, 64], strides = [1, 1]} : vector<8x64xf32> to vector<1x64xf32>
    %142 = vector.broadcast %141 : vector<1x64xf32> to vector<8x64xf32>
    %143 = arith.mulf %130, %142 : vector<8x64xf32>
    %144 = math.exp %143 : vector<8x64xf32>
    %145 = vector.extract_strided_slice %132 {offsets = [0, 1], sizes = [8, 1], strides = [1, 1]} : vector<8x8xf32> to vector<8x1xf32>
    %146 = vector.broadcast %145 : vector<8x1xf32> to vector<8x64xf32>
    %147 = arith.mulf %146, %131 : vector<8x64xf32>
    %148 = vector.extract_strided_slice %127 {offsets = [2, 0], sizes = [1, 64], strides = [1, 1]} : vector<8x64xf32> to vector<1x64xf32>
    %149 = vector.broadcast %148 : vector<1x64xf32> to vector<8x64xf32>
    %150 = arith.mulf %130, %149 : vector<8x64xf32>
    %151 = math.exp %150 : vector<8x64xf32>
    %152 = vector.extract_strided_slice %132 {offsets = [0, 2], sizes = [8, 1], strides = [1, 1]} : vector<8x8xf32> to vector<8x1xf32>
    %153 = vector.broadcast %152 : vector<8x1xf32> to vector<8x64xf32>
    %154 = arith.mulf %153, %131 : vector<8x64xf32>
    %155 = vector.extract_strided_slice %127 {offsets = [3, 0], sizes = [1, 64], strides = [1, 1]} : vector<8x64xf32> to vector<1x64xf32>
    %156 = vector.broadcast %155 : vector<1x64xf32> to vector<8x64xf32>
    %157 = arith.mulf %130, %156 : vector<8x64xf32>
    %158 = math.exp %157 : vector<8x64xf32>
    %159 = vector.extract_strided_slice %132 {offsets = [0, 3], sizes = [8, 1], strides = [1, 1]} : vector<8x8xf32> to vector<8x1xf32>
    %160 = vector.broadcast %159 : vector<8x1xf32> to vector<8x64xf32>
    %161 = arith.mulf %160, %131 : vector<8x64xf32>
    %162 = vector.extract_strided_slice %127 {offsets = [4, 0], sizes = [1, 64], strides = [1, 1]} : vector<8x64xf32> to vector<1x64xf32>
    %163 = vector.broadcast %162 : vector<1x64xf32> to vector<8x64xf32>
    %164 = arith.mulf %130, %163 : vector<8x64xf32>
    %165 = math.exp %164 : vector<8x64xf32>
    %166 = vector.extract_strided_slice %132 {offsets = [0, 4], sizes = [8, 1], strides = [1, 1]} : vector<8x8xf32> to vector<8x1xf32>
    %167 = vector.broadcast %166 : vector<8x1xf32> to vector<8x64xf32>
    %168 = arith.mulf %167, %131 : vector<8x64xf32>
    %169 = vector.extract_strided_slice %127 {offsets = [5, 0], sizes = [1, 64], strides = [1, 1]} : vector<8x64xf32> to vector<1x64xf32>
    %170 = vector.broadcast %169 : vector<1x64xf32> to vector<8x64xf32>
    %171 = arith.mulf %130, %170 : vector<8x64xf32>
    %172 = math.exp %171 : vector<8x64xf32>
    %173 = vector.extract_strided_slice %132 {offsets = [0, 5], sizes = [8, 1], strides = [1, 1]} : vector<8x8xf32> to vector<8x1xf32>
    %174 = vector.broadcast %173 : vector<8x1xf32> to vector<8x64xf32>
    %175 = arith.mulf %174, %131 : vector<8x64xf32>
    %176 = vector.extract_strided_slice %127 {offsets = [6, 0], sizes = [1, 64], strides = [1, 1]} : vector<8x64xf32> to vector<1x64xf32>
    %177 = vector.broadcast %176 : vector<1x64xf32> to vector<8x64xf32>
    %178 = arith.mulf %130, %177 : vector<8x64xf32>
    %179 = math.exp %178 : vector<8x64xf32>
    %180 = vector.extract_strided_slice %132 {offsets = [0, 6], sizes = [8, 1], strides = [1, 1]} : vector<8x8xf32> to vector<8x1xf32>
    %181 = vector.broadcast %180 : vector<8x1xf32> to vector<8x64xf32>
    %182 = arith.mulf %181, %131 : vector<8x64xf32>
    %183 = vector.extract_strided_slice %127 {offsets = [7, 0], sizes = [1, 64], strides = [1, 1]} : vector<8x64xf32> to vector<1x64xf32>
    %184 = vector.broadcast %183 : vector<1x64xf32> to vector<8x64xf32>
    %185 = arith.mulf %130, %184 : vector<8x64xf32>
    %186 = math.exp %185 : vector<8x64xf32>
    %187 = vector.extract_strided_slice %132 {offsets = [0, 7], sizes = [8, 1], strides = [1, 1]} : vector<8x8xf32> to vector<8x1xf32>
    %188 = vector.broadcast %187 : vector<8x1xf32> to vector<8x64xf32>
    %189 = arith.mulf %188, %131 : vector<8x64xf32>
    %190 = vector.extract_strided_slice %121 {offsets = [8, 0], sizes = [8, 64], strides = [1, 1]} : vector<16x64xf32> to vector<8x64xf32>
    %191 = vector.extract_strided_slice %128 {offsets = [8, 0], sizes = [8, 64], strides = [1, 1]} : vector<16x64xf32> to vector<8x64xf32>
    %192 = vector.extract_strided_slice %122 {offsets = [8, 0], sizes = [8, 8], strides = [1, 1]} : vector<16x8xf32> to vector<8x8xf32>
    %193 = vector.extract_strided_slice %123 {offsets = [8, 0], sizes = [8, 8], strides = [1, 1]} : vector<16x8xf32> to vector<8x8xf32>
    %194 = vector.extract_strided_slice %127 {offsets = [0, 0], sizes = [1, 64], strides = [1, 1]} : vector<8x64xf32> to vector<1x64xf32>
    %195 = vector.broadcast %194 : vector<1x64xf32> to vector<8x64xf32>
    %196 = arith.mulf %190, %195 : vector<8x64xf32>
    %197 = math.exp %196 : vector<8x64xf32>
    %198 = vector.extract_strided_slice %192 {offsets = [0, 0], sizes = [8, 1], strides = [1, 1]} : vector<8x8xf32> to vector<8x1xf32>
    %199 = vector.broadcast %198 : vector<8x1xf32> to vector<8x64xf32>
    %200 = arith.mulf %199, %191 : vector<8x64xf32>
    %201 = vector.extract_strided_slice %127 {offsets = [1, 0], sizes = [1, 64], strides = [1, 1]} : vector<8x64xf32> to vector<1x64xf32>
    %202 = vector.broadcast %201 : vector<1x64xf32> to vector<8x64xf32>
    %203 = arith.mulf %190, %202 : vector<8x64xf32>
    %204 = math.exp %203 : vector<8x64xf32>
    %205 = vector.extract_strided_slice %192 {offsets = [0, 1], sizes = [8, 1], strides = [1, 1]} : vector<8x8xf32> to vector<8x1xf32>
    %206 = vector.broadcast %205 : vector<8x1xf32> to vector<8x64xf32>
    %207 = arith.mulf %206, %191 : vector<8x64xf32>
    %208 = vector.extract_strided_slice %127 {offsets = [2, 0], sizes = [1, 64], strides = [1, 1]} : vector<8x64xf32> to vector<1x64xf32>
    %209 = vector.broadcast %208 : vector<1x64xf32> to vector<8x64xf32>
    %210 = arith.mulf %190, %209 : vector<8x64xf32>
    %211 = math.exp %210 : vector<8x64xf32>
    %212 = vector.extract_strided_slice %192 {offsets = [0, 2], sizes = [8, 1], strides = [1, 1]} : vector<8x8xf32> to vector<8x1xf32>
    %213 = vector.broadcast %212 : vector<8x1xf32> to vector<8x64xf32>
    %214 = arith.mulf %213, %191 : vector<8x64xf32>
    %215 = vector.extract_strided_slice %127 {offsets = [3, 0], sizes = [1, 64], strides = [1, 1]} : vector<8x64xf32> to vector<1x64xf32>
    %216 = vector.broadcast %215 : vector<1x64xf32> to vector<8x64xf32>
    %217 = arith.mulf %190, %216 : vector<8x64xf32>
    %218 = math.exp %217 : vector<8x64xf32>
    %219 = vector.extract_strided_slice %192 {offsets = [0, 3], sizes = [8, 1], strides = [1, 1]} : vector<8x8xf32> to vector<8x1xf32>
    %220 = vector.broadcast %219 : vector<8x1xf32> to vector<8x64xf32>
    %221 = arith.mulf %220, %191 : vector<8x64xf32>
    %222 = vector.extract_strided_slice %127 {offsets = [4, 0], sizes = [1, 64], strides = [1, 1]} : vector<8x64xf32> to vector<1x64xf32>
    %223 = vector.broadcast %222 : vector<1x64xf32> to vector<8x64xf32>
    %224 = arith.mulf %190, %223 : vector<8x64xf32>
    %225 = math.exp %224 : vector<8x64xf32>
    %226 = vector.extract_strided_slice %192 {offsets = [0, 4], sizes = [8, 1], strides = [1, 1]} : vector<8x8xf32> to vector<8x1xf32>
    %227 = vector.broadcast %226 : vector<8x1xf32> to vector<8x64xf32>
    %228 = arith.mulf %227, %191 : vector<8x64xf32>
    %229 = vector.extract_strided_slice %127 {offsets = [5, 0], sizes = [1, 64], strides = [1, 1]} : vector<8x64xf32> to vector<1x64xf32>
    %230 = vector.broadcast %229 : vector<1x64xf32> to vector<8x64xf32>
    %231 = arith.mulf %190, %230 : vector<8x64xf32>
    %232 = math.exp %231 : vector<8x64xf32>
    %233 = vector.extract_strided_slice %192 {offsets = [0, 5], sizes = [8, 1], strides = [1, 1]} : vector<8x8xf32> to vector<8x1xf32>
    %234 = vector.broadcast %233 : vector<8x1xf32> to vector<8x64xf32>
    %235 = arith.mulf %234, %191 : vector<8x64xf32>
    %236 = vector.extract_strided_slice %127 {offsets = [6, 0], sizes = [1, 64], strides = [1, 1]} : vector<8x64xf32> to vector<1x64xf32>
    %237 = vector.broadcast %236 : vector<1x64xf32> to vector<8x64xf32>
    %238 = arith.mulf %190, %237 : vector<8x64xf32>
    %239 = math.exp %238 : vector<8x64xf32>
    %240 = vector.extract_strided_slice %192 {offsets = [0, 6], sizes = [8, 1], strides = [1, 1]} : vector<8x8xf32> to vector<8x1xf32>
    %241 = vector.broadcast %240 : vector<8x1xf32> to vector<8x64xf32>
    %242 = arith.mulf %241, %191 : vector<8x64xf32>
    %243 = vector.extract_strided_slice %127 {offsets = [7, 0], sizes = [1, 64], strides = [1, 1]} : vector<8x64xf32> to vector<1x64xf32>
    %244 = vector.broadcast %243 : vector<1x64xf32> to vector<8x64xf32>
    %245 = arith.mulf %190, %244 : vector<8x64xf32>
    %246 = math.exp %245 : vector<8x64xf32>
    %247 = vector.extract_strided_slice %192 {offsets = [0, 7], sizes = [8, 1], strides = [1, 1]} : vector<8x8xf32> to vector<8x1xf32>
    %248 = vector.broadcast %247 : vector<8x1xf32> to vector<8x64xf32>
    %249 = arith.mulf %248, %191 : vector<8x64xf32>
    %250 = tpu.concatenate %137, %144, %151, %158, %165, %172, %179, %186, %197, %204, %211, %218, %225, %232, %239, %246 in 1 : vector<8x64xf32>, vector<8x64xf32>, vector<8x64xf32>, vector<8x64xf32>, vector<8x64xf32>, vector<8x64xf32>, vector<8x64xf32>, vector<8x64xf32>, vector<8x64xf32>, vector<8x64xf32>, vector<8x64xf32>, vector<8x64xf32>, vector<8x64xf32>, vector<8x64xf32>, vector<8x64xf32>, vector<8x64xf32> -> vector<8x1024xf32>
    %251 = tpu.concatenate %140, %147, %154, %161, %168, %175, %182, %189, %200, %207, %214, %221, %228, %235, %242, %249 in 1 : vector<8x64xf32>, vector<8x64xf32>, vector<8x64xf32>, vector<8x64xf32>, vector<8x64xf32>, vector<8x64xf32>, vector<8x64xf32>, vector<8x64xf32>, vector<8x64xf32>, vector<8x64xf32>, vector<8x64xf32>, vector<8x64xf32>, vector<8x64xf32>, vector<8x64xf32>, vector<8x64xf32>, vector<8x64xf32> -> vector<8x1024xf32>
    %cst_46 = arith.constant 1.000000e+00 : f32
    %252 = vector.broadcast %cst_46 : f32 to vector<1x1024xf32>
    %253 = vector.extract_strided_slice %250 {offsets = [0, 0], sizes = [7, 1024], strides = [1, 1]} : vector<8x1024xf32> to vector<7x1024xf32>
    %254 = tpu.concatenate %252, %253 in 0 : vector<1x1024xf32>, vector<7x1024xf32> -> vector<8x1024xf32>
    %cst_47 = arith.constant 0.000000e+00 : f32
    %255 = vector.broadcast %cst_47 : f32 to vector<1x1024xf32>
    %256 = vector.extract_strided_slice %251 {offsets = [0, 0], sizes = [7, 1024], strides = [1, 1]} : vector<8x1024xf32> to vector<7x1024xf32>
    %257 = tpu.concatenate %255, %256 in 0 : vector<1x1024xf32>, vector<7x1024xf32> -> vector<8x1024xf32>
    %258 = arith.mulf %250, %257 : vector<8x1024xf32>
    %259 = arith.addf %258, %251 : vector<8x1024xf32>
    %260 = arith.mulf %250, %254 : vector<8x1024xf32>
    %cst_48 = arith.constant 1.000000e+00 : f32
    %261 = vector.broadcast %cst_48 : f32 to vector<2x1024xf32>
    %262 = vector.extract_strided_slice %260 {offsets = [0, 0], sizes = [6, 1024], strides = [1, 1]} : vector<8x1024xf32> to vector<6x1024xf32>
    %263 = tpu.concatenate %261, %262 in 0 : vector<2x1024xf32>, vector<6x1024xf32> -> vector<8x1024xf32>
    %cst_49 = arith.constant 0.000000e+00 : f32
    %264 = vector.broadcast %cst_49 : f32 to vector<2x1024xf32>
    %265 = vector.extract_strided_slice %259 {offsets = [0, 0], sizes = [6, 1024], strides = [1, 1]} : vector<8x1024xf32> to vector<6x1024xf32>
    %266 = tpu.concatenate %264, %265 in 0 : vector<2x1024xf32>, vector<6x1024xf32> -> vector<8x1024xf32>
    %267 = arith.mulf %260, %266 : vector<8x1024xf32>
    %268 = arith.addf %267, %259 : vector<8x1024xf32>
    %269 = arith.mulf %260, %263 : vector<8x1024xf32>
    %cst_50 = arith.constant 1.000000e+00 : f32
    %270 = vector.broadcast %cst_50 : f32 to vector<4x1024xf32>
    %271 = vector.extract_strided_slice %269 {offsets = [0, 0], sizes = [4, 1024], strides = [1, 1]} : vector<8x1024xf32> to vector<4x1024xf32>
    %272 = tpu.concatenate %270, %271 in 0 : vector<4x1024xf32>, vector<4x1024xf32> -> vector<8x1024xf32>
    %cst_51 = arith.constant 0.000000e+00 : f32
    %273 = vector.broadcast %cst_51 : f32 to vector<4x1024xf32>
    %274 = vector.extract_strided_slice %268 {offsets = [0, 0], sizes = [4, 1024], strides = [1, 1]} : vector<8x1024xf32> to vector<4x1024xf32>
    %275 = tpu.concatenate %273, %274 in 0 : vector<4x1024xf32>, vector<4x1024xf32> -> vector<8x1024xf32>
    %276 = arith.mulf %269, %275 : vector<8x1024xf32>
    %277 = arith.addf %276, %268 : vector<8x1024xf32>
    %278 = arith.mulf %269, %272 : vector<8x1024xf32>
    %279 = vector.broadcast %129 : vector<1x1024xf32> to vector<8x1024xf32>
    %280 = arith.mulf %278, %279 : vector<8x1024xf32>
    %281 = arith.addf %280, %277 : vector<8x1024xf32>
    %282 = vector.extract_strided_slice %281 {offsets = [7, 0], sizes = [1, 1024], strides = [1, 1]} : vector<8x1024xf32> to vector<1x1024xf32>
    %283 = vector.extract_strided_slice %281 {offsets = [0, 0], sizes = [8, 64], strides = [1, 1]} : vector<8x1024xf32> to vector<8x64xf32>
    %284 = vector.extract_strided_slice %133 {offsets = [0, 0], sizes = [8, 1], strides = [1, 1]} : vector<8x8xf32> to vector<8x1xf32>
    %285 = vector.broadcast %284 : vector<8x1xf32> to vector<8x64xf32>
    %286 = arith.mulf %283, %285 : vector<8x64xf32>
    %287 = vector.extract_strided_slice %281 {offsets = [0, 64], sizes = [8, 64], strides = [1, 1]} : vector<8x1024xf32> to vector<8x64xf32>
    %288 = vector.extract_strided_slice %133 {offsets = [0, 1], sizes = [8, 1], strides = [1, 1]} : vector<8x8xf32> to vector<8x1xf32>
    %289 = vector.broadcast %288 : vector<8x1xf32> to vector<8x64xf32>
    %290 = arith.mulf %287, %289 : vector<8x64xf32>
    %291 = arith.addf %286, %290 : vector<8x64xf32>
    %292 = vector.extract_strided_slice %281 {offsets = [0, 128], sizes = [8, 64], strides = [1, 1]} : vector<8x1024xf32> to vector<8x64xf32>
    %293 = vector.extract_strided_slice %133 {offsets = [0, 2], sizes = [8, 1], strides = [1, 1]} : vector<8x8xf32> to vector<8x1xf32>
    %294 = vector.broadcast %293 : vector<8x1xf32> to vector<8x64xf32>
    %295 = arith.mulf %292, %294 : vector<8x64xf32>
    %296 = arith.addf %291, %295 : vector<8x64xf32>
    %297 = vector.extract_strided_slice %281 {offsets = [0, 192], sizes = [8, 64], strides = [1, 1]} : vector<8x1024xf32> to vector<8x64xf32>
    %298 = vector.extract_strided_slice %133 {offsets = [0, 3], sizes = [8, 1], strides = [1, 1]} : vector<8x8xf32> to vector<8x1xf32>
    %299 = vector.broadcast %298 : vector<8x1xf32> to vector<8x64xf32>
    %300 = arith.mulf %297, %299 : vector<8x64xf32>
    %301 = arith.addf %296, %300 : vector<8x64xf32>
    %302 = vector.extract_strided_slice %281 {offsets = [0, 256], sizes = [8, 64], strides = [1, 1]} : vector<8x1024xf32> to vector<8x64xf32>
    %303 = vector.extract_strided_slice %133 {offsets = [0, 4], sizes = [8, 1], strides = [1, 1]} : vector<8x8xf32> to vector<8x1xf32>
    %304 = vector.broadcast %303 : vector<8x1xf32> to vector<8x64xf32>
    %305 = arith.mulf %302, %304 : vector<8x64xf32>
    %306 = arith.addf %301, %305 : vector<8x64xf32>
    %307 = vector.extract_strided_slice %281 {offsets = [0, 320], sizes = [8, 64], strides = [1, 1]} : vector<8x1024xf32> to vector<8x64xf32>
    %308 = vector.extract_strided_slice %133 {offsets = [0, 5], sizes = [8, 1], strides = [1, 1]} : vector<8x8xf32> to vector<8x1xf32>
    %309 = vector.broadcast %308 : vector<8x1xf32> to vector<8x64xf32>
    %310 = arith.mulf %307, %309 : vector<8x64xf32>
    %311 = arith.addf %306, %310 : vector<8x64xf32>
    %312 = vector.extract_strided_slice %281 {offsets = [0, 384], sizes = [8, 64], strides = [1, 1]} : vector<8x1024xf32> to vector<8x64xf32>
    %313 = vector.extract_strided_slice %133 {offsets = [0, 6], sizes = [8, 1], strides = [1, 1]} : vector<8x8xf32> to vector<8x1xf32>
    %314 = vector.broadcast %313 : vector<8x1xf32> to vector<8x64xf32>
    %315 = arith.mulf %312, %314 : vector<8x64xf32>
    %316 = arith.addf %311, %315 : vector<8x64xf32>
    %317 = vector.extract_strided_slice %281 {offsets = [0, 448], sizes = [8, 64], strides = [1, 1]} : vector<8x1024xf32> to vector<8x64xf32>
    %318 = vector.extract_strided_slice %133 {offsets = [0, 7], sizes = [8, 1], strides = [1, 1]} : vector<8x8xf32> to vector<8x1xf32>
    %319 = vector.broadcast %318 : vector<8x1xf32> to vector<8x64xf32>
    %320 = arith.mulf %317, %319 : vector<8x64xf32>
    %321 = arith.addf %316, %320 : vector<8x64xf32>
    %322 = vector.extract_strided_slice %281 {offsets = [0, 512], sizes = [8, 64], strides = [1, 1]} : vector<8x1024xf32> to vector<8x64xf32>
    %323 = vector.extract_strided_slice %193 {offsets = [0, 0], sizes = [8, 1], strides = [1, 1]} : vector<8x8xf32> to vector<8x1xf32>
    %324 = vector.broadcast %323 : vector<8x1xf32> to vector<8x64xf32>
    %325 = arith.mulf %322, %324 : vector<8x64xf32>
    %326 = vector.extract_strided_slice %281 {offsets = [0, 576], sizes = [8, 64], strides = [1, 1]} : vector<8x1024xf32> to vector<8x64xf32>
    %327 = vector.extract_strided_slice %193 {offsets = [0, 1], sizes = [8, 1], strides = [1, 1]} : vector<8x8xf32> to vector<8x1xf32>
    %328 = vector.broadcast %327 : vector<8x1xf32> to vector<8x64xf32>
    %329 = arith.mulf %326, %328 : vector<8x64xf32>
    %330 = arith.addf %325, %329 : vector<8x64xf32>
    %331 = vector.extract_strided_slice %281 {offsets = [0, 640], sizes = [8, 64], strides = [1, 1]} : vector<8x1024xf32> to vector<8x64xf32>
    %332 = vector.extract_strided_slice %193 {offsets = [0, 2], sizes = [8, 1], strides = [1, 1]} : vector<8x8xf32> to vector<8x1xf32>
    %333 = vector.broadcast %332 : vector<8x1xf32> to vector<8x64xf32>
    %334 = arith.mulf %331, %333 : vector<8x64xf32>
    %335 = arith.addf %330, %334 : vector<8x64xf32>
    %336 = vector.extract_strided_slice %281 {offsets = [0, 704], sizes = [8, 64], strides = [1, 1]} : vector<8x1024xf32> to vector<8x64xf32>
    %337 = vector.extract_strided_slice %193 {offsets = [0, 3], sizes = [8, 1], strides = [1, 1]} : vector<8x8xf32> to vector<8x1xf32>
    %338 = vector.broadcast %337 : vector<8x1xf32> to vector<8x64xf32>
    %339 = arith.mulf %336, %338 : vector<8x64xf32>
    %340 = arith.addf %335, %339 : vector<8x64xf32>
    %341 = vector.extract_strided_slice %281 {offsets = [0, 768], sizes = [8, 64], strides = [1, 1]} : vector<8x1024xf32> to vector<8x64xf32>
    %342 = vector.extract_strided_slice %193 {offsets = [0, 4], sizes = [8, 1], strides = [1, 1]} : vector<8x8xf32> to vector<8x1xf32>
    %343 = vector.broadcast %342 : vector<8x1xf32> to vector<8x64xf32>
    %344 = arith.mulf %341, %343 : vector<8x64xf32>
    %345 = arith.addf %340, %344 : vector<8x64xf32>
    %346 = vector.extract_strided_slice %281 {offsets = [0, 832], sizes = [8, 64], strides = [1, 1]} : vector<8x1024xf32> to vector<8x64xf32>
    %347 = vector.extract_strided_slice %193 {offsets = [0, 5], sizes = [8, 1], strides = [1, 1]} : vector<8x8xf32> to vector<8x1xf32>
    %348 = vector.broadcast %347 : vector<8x1xf32> to vector<8x64xf32>
    %349 = arith.mulf %346, %348 : vector<8x64xf32>
    %350 = arith.addf %345, %349 : vector<8x64xf32>
    %351 = vector.extract_strided_slice %281 {offsets = [0, 896], sizes = [8, 64], strides = [1, 1]} : vector<8x1024xf32> to vector<8x64xf32>
    %352 = vector.extract_strided_slice %193 {offsets = [0, 6], sizes = [8, 1], strides = [1, 1]} : vector<8x8xf32> to vector<8x1xf32>
    %353 = vector.broadcast %352 : vector<8x1xf32> to vector<8x64xf32>
    %354 = arith.mulf %351, %353 : vector<8x64xf32>
    %355 = arith.addf %350, %354 : vector<8x64xf32>
    %356 = vector.extract_strided_slice %281 {offsets = [0, 960], sizes = [8, 64], strides = [1, 1]} : vector<8x1024xf32> to vector<8x64xf32>
    %357 = vector.extract_strided_slice %193 {offsets = [0, 7], sizes = [8, 1], strides = [1, 1]} : vector<8x8xf32> to vector<8x1xf32>
    %358 = vector.broadcast %357 : vector<8x1xf32> to vector<8x64xf32>
    %359 = arith.mulf %356, %358 : vector<8x64xf32>
    %360 = arith.addf %355, %359 : vector<8x64xf32>
    %c0_52 = arith.constant 0 : index
    %c0_53 = arith.constant 0 : index
    %361 = vector.load %arg17[%c0_52, %c0_53] : memref<1x1024xf32, #tpu.memory_space<vmem>>, vector<1x1024xf32>
    tpu.vector_store %arg17[%c0_52, %c0_53], %282 {strides = array<i32>} : memref<1x1024xf32, #tpu.memory_space<vmem>>, vector<1x1024xf32>,
    %362 = tpu.concatenate %321, %360 in 0 : vector<8x64xf32>, vector<8x64xf32> -> vector<16x64xf32>
    %c0_54 = arith.constant 0 : index
    %c0_55 = arith.constant 0 : index
    %363 = vector.load %arg12[%c0_54, %c0_55] : memref<1x64xf32, #tpu.memory_space<vmem>>, vector<1x64xf32>
    %364 = vector.broadcast %363 : vector<1x64xf32> to vector<16x64xf32>
    %365 = arith.mulf %364, %94 : vector<16x64xf32>
    %366 = arith.addf %362, %365 : vector<16x64xf32>
    %cst_56 = arith.constant 0.000000e+00 : f32
    %367 = vector.broadcast %cst_56 : f32 to vector<16x64xf32>
    %368 = arith.subf %367, %34 : vector<16x64xf32>
    %369 = math.exp %368 : vector<16x64xf32>
    %cst_57 = arith.constant 1.000000e+00 : f32
    %370 = vector.broadcast %cst_57 : f32 to vector<16x64xf32>
    %371 = arith.addf %370, %369 : vector<16x64xf32>
    %372 = tpu.reciprocal %371 {approx = true} : vector<16x64xf32> -> vector<16x64xf32>
    %373 = arith.mulf %34, %372 : vector<16x64xf32>
    %374 = arith.mulf %366, %373 : vector<16x64xf32>
    %375 = arith.truncf %374 : vector<16x64xf32> to vector<16x64xbf16>
    %c0_58 = arith.constant 0 : index
    %c0_59 = arith.constant 0 : index
    %376 = vector.load %arg13[%c0_58, %c0_59] : memref<64x32xbf16, #tpu.memory_space<vmem>>, vector<64x32xbf16>
    %cst_60 = arith.constant dense<0.000000e+00> : vector<16x32xf32>
    %377 = tpu.matmul %375, %376, %cst_60 {dimension_numbers = #tpu.dot_dimension_numbers<[1], [0], [0], [1], [0, 0, 1, 1], [], []>} : vector<16x64xbf16>, vector<64x32xbf16>, vector<16x32xf32> -> vector<16x32xf32>
    %cst_61 = arith.constant 5.000000e-01 : f32
    %378 = vector.broadcast %cst_61 : f32 to vector<16x32xf32>
    %379 = arith.mulf %378, %377 : vector<16x32xf32>
    %cst_62 = arith.constant 0.707106769 : f32
    %380 = vector.broadcast %cst_62 : f32 to vector<16x32xf32>
    %381 = arith.mulf %377, %380 : vector<16x32xf32>
    %cst_63 = arith.constant 0.000000e+00 : f32
    %382 = vector.broadcast %cst_63 : f32 to vector<16x32xf32>
    %383 = arith.cmpf oge, %381, %382 : vector<16x32xf32>
    %cst_64 = arith.constant 1.000000e+00 : f32
    %cst_65 = arith.constant -1.000000e+00 : f32
    %384 = vector.broadcast %cst_64 : f32 to vector<16x32xf32>
    %385 = vector.broadcast %cst_65 : f32 to vector<16x32xf32>
    %386 = arith.select %383, %384, %385 : vector<16x32xi1>, vector<16x32xf32>
    %387 = math.absf %381 : vector<16x32xf32>
    %cst_66 = arith.constant 0.327591091 : f32
    %388 = vector.broadcast %cst_66 : f32 to vector<16x32xf32>
    %389 = arith.mulf %388, %387 : vector<16x32xf32>
    %cst_67 = arith.constant 1.000000e+00 : f32
    %390 = vector.broadcast %cst_67 : f32 to vector<16x32xf32>
    %391 = arith.addf %390, %389 : vector<16x32xf32>
    %cst_68 = arith.constant 1.000000e+00 : f32
    %392 = vector.broadcast %cst_68 : f32 to vector<16x32xf32>
    %393 = arith.divf %392, %391 : vector<16x32xf32>
    %cst_69 = arith.constant 1.06140542 : f32
    %394 = vector.broadcast %cst_69 : f32 to vector<16x32xf32>
    %395 = arith.mulf %394, %393 : vector<16x32xf32>
    %cst_70 = arith.constant -1.45315206 : f32
    %396 = vector.broadcast %cst_70 : f32 to vector<16x32xf32>
    %397 = arith.addf %395, %396 : vector<16x32xf32>
    %398 = arith.mulf %397, %393 : vector<16x32xf32>
    %cst_71 = arith.constant 1.42141378 : f32
    %399 = vector.broadcast %cst_71 : f32 to vector<16x32xf32>
    %400 = arith.addf %398, %399 : vector<16x32xf32>
    %401 = arith.mulf %400, %393 : vector<16x32xf32>
    %cst_72 = arith.constant -0.284496725 : f32
    %402 = vector.broadcast %cst_72 : f32 to vector<16x32xf32>
    %403 = arith.addf %401, %402 : vector<16x32xf32>
    %404 = arith.mulf %403, %393 : vector<16x32xf32>
    %cst_73 = arith.constant 0.254829586 : f32
    %405 = vector.broadcast %cst_73 : f32 to vector<16x32xf32>
    %406 = arith.addf %404, %405 : vector<16x32xf32>
    %407 = arith.mulf %406, %393 : vector<16x32xf32>
    %cst_74 = arith.constant 0.000000e+00 : f32
    %408 = vector.broadcast %cst_74 : f32 to vector<16x32xf32>
    %409 = arith.subf %408, %387 : vector<16x32xf32>
    %410 = arith.mulf %409, %387 : vector<16x32xf32>
    %411 = math.exp %410 : vector<16x32xf32>
    %412 = arith.mulf %407, %411 : vector<16x32xf32>
    %cst_75 = arith.constant 1.000000e+00 : f32
    %413 = vector.broadcast %cst_75 : f32 to vector<16x32xf32>
    %414 = arith.subf %413, %412 : vector<16x32xf32>
    %415 = arith.mulf %386, %414 : vector<16x32xf32>
    %cst_76 = arith.constant 1.000000e+00 : f32
    %416 = vector.broadcast %cst_76 : f32 to vector<16x32xf32>
    %417 = arith.addf %416, %415 : vector<16x32xf32>
    %418 = arith.mulf %379, %417 : vector<16x32xf32>
    %419 = arith.truncf %418 : vector<16x32xf32> to vector<16x32xbf16>
    %c0_77 = arith.constant 0 : index
    %c0_78 = arith.constant 0 : index
    %420 = vector.load %arg14[%c0_77, %c0_78] : memref<32x64xbf16, #tpu.memory_space<vmem>>, vector<32x64xbf16>
    %cst_79 = arith.constant dense<0.000000e+00> : vector<16x64xf32>
    %421 = tpu.matmul %419, %420, %cst_79 {dimension_numbers = #tpu.dot_dimension_numbers<[1], [0], [0], [1], [0, 0, 1, 1], [], []>} : vector<16x32xbf16>, vector<32x64xbf16>, vector<16x64xf32> -> vector<16x64xf32>
    %c0_80 = arith.constant 0 : index
    %c0_81 = arith.constant 0 : index
    %422 = vector.load %arg15[%c0_80, %c0_81] : memref<1x64xf32, #tpu.memory_space<vmem>>, vector<1x64xf32>
    %423 = vector.broadcast %422 : vector<1x64xf32> to vector<16x64xf32>
    %424 = arith.addf %421, %423 : vector<16x64xf32>
    %425 = vector.extract_strided_slice %424 {offsets = [0, 0], sizes = [16, 32], strides = [1, 1]} : vector<16x64xf32> to vector<16x32xf32>
    %426 = vector.extract_strided_slice %424 {offsets = [0, 32], sizes = [16, 32], strides = [1, 1]} : vector<16x64xf32> to vector<16x32xf32>
    %cst_82 = arith.constant 0.000000e+00 : f32
    %427 = vector.broadcast %cst_82 : f32 to vector<16x32xf32>
    %428 = arith.subf %427, %426 : vector<16x32xf32>
    %429 = math.exp %428 : vector<16x32xf32>
    %cst_83 = arith.constant 1.000000e+00 : f32
    %430 = vector.broadcast %cst_83 : f32 to vector<16x32xf32>
    %431 = arith.addf %430, %429 : vector<16x32xf32>
    %432 = tpu.reciprocal %431 {approx = true} : vector<16x32xf32> -> vector<16x32xf32>
    %433 = arith.mulf %425, %432 : vector<16x32xf32>
    %434 = arith.addf %433, %7 : vector<16x32xf32>
    %435 = vector.extract_strided_slice %434 {offsets = [0, 0], sizes = [8, 32], strides = [1, 1]} : vector<16x32xf32> to vector<8x32xf32>
    %c0_84 = arith.constant 0 : index
    %c0_85 = arith.constant 0 : index
    %c0_86 = arith.constant 0 : index
    %436 = vector.load %arg16[%c0_84, %c0_85, %c0_86] : memref<2x8x32xf32, #tpu.memory_space<vmem>>, vector<1x8x32xf32>
    %437 = vector.shape_cast %436 : vector<1x8x32xf32> to vector<8x32xf32>
    %438 = vector.shape_cast %435 : vector<8x32xf32> to vector<1x8x32xf32>
    tpu.vector_store %arg16[%c0_84, %c0_85, %c0_86], %438 {strides = array<i32>} : memref<2x8x32xf32, #tpu.memory_space<vmem>>, vector<1x8x32xf32>,
    %439 = vector.extract_strided_slice %434 {offsets = [8, 0], sizes = [8, 32], strides = [1, 1]} : vector<16x32xf32> to vector<8x32xf32>
    %c1_87 = arith.constant 1 : index
    %c0_88 = arith.constant 0 : index
    %c0_89 = arith.constant 0 : index
    %440 = vector.load %arg16[%c1_87, %c0_88, %c0_89] : memref<2x8x32xf32, #tpu.memory_space<vmem>>, vector<1x8x32xf32>
    %441 = vector.shape_cast %440 : vector<1x8x32xf32> to vector<8x32xf32>
    %442 = vector.shape_cast %439 : vector<8x32xf32> to vector<1x8x32xf32>
    tpu.vector_store %arg16[%c1_87, %c0_88, %c0_89], %442 {strides = array<i32>} : memref<2x8x32xf32, #tpu.memory_space<vmem>>, vector<1x8x32xf32>,
    return
  }
  func.func @transform_0(%arg0: i32, %arg1: i32) -> (i32, i32, i32) {
    %c0_i32 = arith.constant 0 : i32
    %c0_i32_0 = arith.constant 0 : i32
    return %arg0, %arg1, %c0_i32 : i32, i32, i32
  }
  func.func @transform_1(%arg0: i32, %arg1: i32) -> (i32, i32) {
    %c0_i32 = arith.constant 0 : i32
    %c0_i32_0 = arith.constant 0 : i32
    %c0_i32_1 = arith.constant 0 : i32
    return %c0_i32, %c0_i32_0 : i32, i32
  }
  func.func @transform_2(%arg0: i32, %arg1: i32) -> (i32, i32) {
    %c0_i32 = arith.constant 0 : i32
    %c0_i32_0 = arith.constant 0 : i32
    %c0_i32_1 = arith.constant 0 : i32
    return %c0_i32, %c0_i32_0 : i32, i32
  }
  func.func @transform_3(%arg0: i32, %arg1: i32) -> (i32, i32) {
    %c0_i32 = arith.constant 0 : i32
    %c0_i32_0 = arith.constant 0 : i32
    %c0_i32_1 = arith.constant 0 : i32
    return %c0_i32, %c0_i32_0 : i32, i32
  }
  func.func @transform_4(%arg0: i32, %arg1: i32) -> (i32, i32) {
    %c0_i32 = arith.constant 0 : i32
    %c0_i32_0 = arith.constant 0 : i32
    %c0_i32_1 = arith.constant 0 : i32
    return %c0_i32, %c0_i32_0 : i32, i32
  }
  func.func @transform_5(%arg0: i32, %arg1: i32) -> (i32, i32) {
    %c0_i32 = arith.constant 0 : i32
    %c0_i32_0 = arith.constant 0 : i32
    %c0_i32_1 = arith.constant 0 : i32
    return %c0_i32, %c0_i32_0 : i32, i32
  }
  func.func @transform_6(%arg0: i32, %arg1: i32) -> (i32, i32) {
    %c0_i32 = arith.constant 0 : i32
    %c0_i32_0 = arith.constant 0 : i32
    %c0_i32_1 = arith.constant 0 : i32
    return %c0_i32, %c0_i32_0 : i32, i32
  }
  func.func @transform_7(%arg0: i32, %arg1: i32) -> (i32, i32) {
    %c0_i32 = arith.constant 0 : i32
    %c0_i32_0 = arith.constant 0 : i32
    %c0_i32_1 = arith.constant 0 : i32
    return %c0_i32, %c0_i32_0 : i32, i32
  }
  func.func @transform_8(%arg0: i32, %arg1: i32) -> (i32, i32) {
    %c0_i32 = arith.constant 0 : i32
    %c0_i32_0 = arith.constant 0 : i32
    %c0_i32_1 = arith.constant 0 : i32
    return %c0_i32, %c0_i32_0 : i32, i32
  }
  func.func @transform_9(%arg0: i32, %arg1: i32) -> (i32, i32) {
    %c0_i32 = arith.constant 0 : i32
    %c0_i32_0 = arith.constant 0 : i32
    %c0_i32_1 = arith.constant 0 : i32
    return %c0_i32, %c0_i32_0 : i32, i32
  }
  func.func @transform_10(%arg0: i32, %arg1: i32) -> (i32, i32) {
    %c0_i32 = arith.constant 0 : i32
    %c0_i32_0 = arith.constant 0 : i32
    %c0_i32_1 = arith.constant 0 : i32
    return %c0_i32, %c0_i32_0 : i32, i32
  }
  func.func @transform_11(%arg0: i32, %arg1: i32) -> (i32, i32) {
    %c0_i32 = arith.constant 0 : i32
    %c0_i32_0 = arith.constant 0 : i32
    %c0_i32_1 = arith.constant 0 : i32
    return %c0_i32, %c0_i32_0 : i32, i32
  }
  func.func @transform_12(%arg0: i32, %arg1: i32) -> (i32, i32) {
    %c0_i32 = arith.constant 0 : i32
    %c0_i32_0 = arith.constant 0 : i32
    %c0_i32_1 = arith.constant 0 : i32
    return %c0_i32, %c0_i32_0 : i32, i32
  }
  func.func @transform_13(%arg0: i32, %arg1: i32) -> (i32, i32) {
    %c0_i32 = arith.constant 0 : i32
    %c0_i32_0 = arith.constant 0 : i32
    %c0_i32_1 = arith.constant 0 : i32
    return %c0_i32, %c0_i32_0 : i32, i32
  }
  func.func @transform_14(%arg0: i32, %arg1: i32) -> (i32, i32, i32) {
    %c0_i32 = arith.constant 0 : i32
    %c0_i32_0 = arith.constant 0 : i32
    return %arg0, %arg1, %c0_i32 : i32, i32, i32
  }
}

</mosaic_0001>

<bundles_post_ra>
// kernel: tpu_custom_call.1
= control target key start
LH: loop header
LB: loop body
LE: loop exit
PB: predicated region body
PF: predicated region fallthrough
CT: control target
= control target key end

     0   :  { %s3829_s0 = inlined_call_operand.hbm [shape: f32[4,16,32], index: 0, kind: input, shape index: {}]   ;;  %s3830_s1 = inlined_call_operand.hbm [shape: f32[1,32], index: 1, kind: input, shape index: {}]   ;;  %s3831_s2 = inlined_call_operand.hbm [shape: f32[1,32], index: 2, kind: input, shape index: {}]   ;;  %s3832_s3 = inlined_call_operand.vmem [shape: bf16[32,128], index: 3, kind: input, shape index: {}]   ;;  %s3833_s4 = inlined_call_operand.vmem [shape: f32[4,64], index: 4, kind: input, shape index: {}]   ;;  %s3834_s5 = inlined_call_operand.hbm [shape: f32[1,64], index: 5, kind: input, shape index: {}]   ;;  %s3835_s6 = inlined_call_operand.vmem [shape: bf16[64,128], index: 6, kind: input, shape index: {}]   ;;  %s3836_s7 = inlined_call_operand.hbm [shape: f32[2,64], index: 7, kind: input, shape index: {}]   ;;  %s3837_s8 = inlined_call_operand.hbm [shape: f32[1,64], index: 8, kind: input, shape index: {}]   ;;  %s3838_s9 = inlined_call_operand.hbm [shape: f32[8,64], index: 9, kind: input, shape index: {}]   ;;  %s3839_s10 = inlined_call_operand.hbm [shape: f32[1,64], index: 10, kind: input, shape index: {}]   ;;  %s3840_s11 = inlined_call_operand.vmem [shape: bf16[64,32], index: 11, kind: input, shape index: {}]   ;;  %s3841_s12 = inlined_call_operand.hbm [shape: bf16[32,64], index: 12, kind: input, shape index: {}]   ;;  %s3842_s13 = inlined_call_operand.vmem [shape: f32[1,64], index: 13, kind: input, shape index: {}]   ;;  %s3843_s14 = inlined_call_operand.hbm [shape: f32[4,16,32], index: 14, kind: output, shape index: {}]  }
   0x1   :  { %3853 = sst [smem:[#allocation29_spill]] %s3830_s1 }
   0x2   :  { %3854 = sst [smem:[#allocation30_spill]] %s3831_s2 }
   0x3   :  { %3855 = sst [smem:[#allocation31_spill]] %s3833_s4 }
   0x4   :  { %3856 = sst [smem:[#allocation32_spill]] %s3834_s5 }
   0x5   :  { %3857 = sst [smem:[#allocation33_spill]] %s3836_s7 }
   0x6   :  { %3858 = sst [smem:[#allocation34_spill]] %s3837_s8 }
   0x7   :  { %3859 = sst [smem:[#allocation35_spill]] %s3838_s9 }
   0x8   :  { %3860 = sst [smem:[#allocation36_spill]] %s3839_s10 }
   0x9   :  { %3861 = sst [smem:[#allocation37_spill]] %s3840_s11 }
   0xa   :  { %3862 = sst [smem:[#allocation38_spill]] %s3841_s12 }
   0xb   :  { %3863 = sst [smem:[#allocation39_spill]] %s3842_s13 }
   0xc   :  { %3864 = sst [smem:[#allocation40_spill]] %s3843_s14 }
   0xd   :  { %19 = vsyncpa [#allocation5], 0 }
   0xe   :  { %21 = vsyncpa [#allocation5 + $0x1], 0 }
   0xf   :  { %22 = vsyncpa [#allocation8], 0 }
  0x10   :  { %23 = vsyncpa [#allocation11], 0 }
  0x11   :  { %24 = vsyncpa [#allocation14], 0 }
  0x12   :  { %25 = vsyncpa [#allocation17], 0 }
  0x13   :  { %26 = vsyncpa [#allocation6], 0 }
  0x14   :  { %28 = vsyncpa [#allocation6 + $0x1], 0  ;;  %s3087_s29 = smov 0   ;;  %s3089_s30 = smov 0  }
  0x15   :  { %s3091_s15 = smov 0   ;;  %s3093_s16 = smov 0  }
  0x16   :  { %s3095_s17 = smov 0   ;;  %s3097_s18 = smov 0  }
  0x17   :  { %s3099_s19 = smov 0   ;;  %s3101_s20 = smov 0  }
  0x18 LB: > { %3865 = sst [smem:[#allocation26_spill]] %s2955_s17  ;;  %s3844_s21 = sadd.s32 4294967295, %s2967_s20   ;;  %s2967_s20 = sphi %s3101_s20, %s34_s20   ;;  %s2963_s19 = sphi %s3099_s19, %s3904_s19   ;;  %s2959_s18 = sphi %s3097_s18, %s3903_s18   ;;  %s2955_s17 = sphi %s3095_s17, %s3902_s17   ;;  %s2951_s16 = sphi %s3093_s16, %s3901_s16   ;;  %s2947_s15 = sphi %s3091_s15, %s3900_s15   ;;  %s2943_s30 = sphi %s3089_s30, %s3899_s30   ;;  %s2939_s29 = sphi %s3087_s29, %s3898_s29  }
  0x19   : > { %p2185_p0 = scmp.ge.s32.totalorder %s2967_s20, 1  ;;  %p3131_p1 = scmp.eq.s32.totalorder %s3844_s21, 0 }
  0x1a   : > { %p380_p2 = scmp.lt.s32.totalorder %s2967_s20, 5  ;;  %s2969_s24 = smov [#allocation7]  }
  0x1b   : > { %s3866_s22 = scalar_select %p3131_p1, 1, 0 }
  0x1c   : > { %p3136_p3 = pnand %p2185_p0, %p380_p2  ;;  %s393_s25 = sshll.u32 %s2969_s24, 4  ;;  %s394_s25 = int_to_ptr.vmem [resolvable:$true] %s393_s25 }
  0x1d   : > { %s2970_s26 = smov [#allocation10]   ;;  %s2971_s21 = smov [#allocation13]  }
  0x1e   : > { %s3867_s23 = scalar_select %p3136_p3, 1, 0 }
  0x1f   : > { %p2337_p4 = pneg %p3136_p3  ;;  %s421_s27 = sshll.u32 %s2970_s26, 4  ;;  %s422_s27 = int_to_ptr.vmem [resolvable:$true] %s421_s27 }
  0x20   : > { %s446_s14 = sshll.u32 %s2971_s21, 4  ;;  %s2630_s24 = scalar_lea.vmem %s394_s25, 16  ;;  %s3148_s14 = int_to_ptr.vmem [resolvable:$true] %s446_s14 }
  0x21   : > { %p3144_p5 = pnand %p2337_p4, %p3131_p1  ;;  %p2631_p7 = scmp.ne.s32.totalorder %s394_s25, %s2630_s24 }
  0x22   : > { %s2637_s26 = scalar_lea.vmem %s394_s25, 32  ;;  %p2638_p10 = scmp.lt.s32.totalorder %s394_s25, %s394_s25 }
  0x23   : > { %p3152_p6 = pneg %p3144_p5  ;;  %p2639_p11 = scmp.lt.s32.totalorder %s2637_s26, %s2630_s24 }
  0x25   : > { %p2633_p8 = pnand %p2631_p7, %p3152_p6  ;;  %p2640_p12 = por %p2639_p11, %p2638_p10 }
  0x27   : > { %p2634_p9 = pneg %p2633_p8 }
  0x29   : > { %p2641_p13 = pnand %p2640_p12, %p2634_p9 }
  0x2b   : > { %2644 = shalt.err (!%p2641_p13)
}
  0x2c   : > { %s3870_s1 = sld [smem:[#allocation29_spill]]  ;;  %s2656_s11 = scalar_lea.vmem %s422_s27, 16 }
  0x2d   : > { %p2657_p0 = scmp.ne.s32.totalorder %s422_s27, %s2656_s11  ;;  %s2663_s4 = scalar_lea.vmem %s422_s27, 32 }
  0x2e   : > { %p2664_p7 = scmp.lt.s32.totalorder %s422_s27, %s422_s27  ;;  %p2665_p8 = scmp.lt.s32.totalorder %s2663_s4, %s2656_s11 }
  0x2f   : > { %p2659_p2 = pnand %p2657_p0, %p3152_p6 }
  0x30   : > { %p2666_p3 = por %p2665_p8, %p2664_p7 }
  0x31   : > { %p2660_p4 = pneg %p2659_p2 }
  0x32   : > { %2340 = dma.hbm_to_vmem [thread:$0]  (!%p3144_p5), %s3870_s1, 16, %s394_s25, [#allocation8]  }
  0x33   : > { %p2667_p1 = pnand %p2666_p3, %p2660_p4 }
  0x35   : > { %2670 = shalt.err (!%p2667_p1)
}
  0x36   : > { %s3871_s5 = sld [smem:[#allocation32_spill]]  ;;  %s2682_s13 = scalar_lea.vmem %s3148_s14, 16 }
  0x37   : > { %p2683_p9 = scmp.ne.s32.totalorder %s3148_s14, %s2682_s13  ;;  %s2689_s4 = scalar_lea.vmem %s3148_s14, 32 }
  0x38   : > { %p2690_p3 = scmp.lt.s32.totalorder %s3148_s14, %s3148_s14  ;;  %p2691_p1 = scmp.lt.s32.totalorder %s2689_s4, %s2682_s13 }
  0x39   : > { %p2685_p10 = pnand %p2683_p9, %p3152_p6 }
  0x3a   : > { %p2692_p12 = por %p2691_p1, %p2690_p3 }
  0x3b   : > { %p2686_p11 = pneg %p2685_p10 }
  0x3c   : > { %2346 = dma.hbm_to_vmem [thread:$0]  (!%p3144_p5), %s3871_s5, 16, %s422_s27, [#allocation11]  }
  0x3d   : > { %p2693_p13 = pnand %p2692_p12, %p2686_p11 }
  0x3f   : > { %2696 = shalt.err (!%p2693_p13)
}
  0x40   : > { %s3872_s8 = sld [smem:[#allocation34_spill]]  ;;  %s2972_s27 = smov [#allocation16]  }
  0x41   : > { %s468_s21 = sshll.u32 %s2972_s27, 4  ;;  %s2973_s24 = smov [#allocation9]   ;;  %s469_s21 = int_to_ptr.vmem [resolvable:$true] %s468_s21 }
  0x42   : > { %s404_s26 = sshll.u32 %s2973_s24, 4  ;;  %s2708_s1 = scalar_lea.vmem %s469_s21, 16  ;;  %s405_s26 = int_to_ptr.vmem [resolvable:$true] %s404_s26 }
  0x43   : > { %p2709_p0 = scmp.ne.s32.totalorder %s469_s21, %s2708_s1  ;;  %s2715_s13 = scalar_lea.vmem %s469_s21, 32 }
  0x44   : > { %p2716_p7 = scmp.lt.s32.totalorder %s469_s21, %s469_s21  ;;  %p2717_p8 = scmp.lt.s32.totalorder %s2715_s13, %s2708_s1 }
  0x45   : > { %p2711_p2 = pnand %p2709_p0, %p3152_p6 }
  0x46   : > { %2352 = dma.hbm_to_vmem [thread:$0]  (!%p3144_p5), %s3872_s8, 16, %s3148_s14, [#allocation14]  }
  0x47   : > { %p2712_p4 = pneg %p2711_p2  ;;  %p2718_p9 = por %p2717_p8, %p2716_p7 }
  0x49   : > { %p2719_p10 = pnand %p2718_p9, %p2712_p4 }
  0x4b   : > { %2722 = shalt.err (!%p2719_p10)
}
  0x4c   : > { %s3873_s10 = sld [smem:[#allocation36_spill]]  ;;  %s2734_s11 = scalar_lea.vmem %s405_s26, 16 }
  0x4d   : > { %p2735_p11 = scmp.ne.s32.totalorder %s405_s26, %s2734_s11  ;;  %s2741_s25 = scalar_lea.vmem %s405_s26, 32 }
  0x4e   : > { %p2742_p12 = scmp.lt.s32.totalorder %s405_s26, %s405_s26  ;;  %p2743_p13 = scmp.lt.s32.totalorder %s2741_s25, %s2734_s11 }
  0x4f   : > { %p2737_p3 = pnand %p2735_p11, %p3152_p6 }
  0x50   : > { %p2744_p0 = por %p2743_p13, %p2742_p12 }
  0x51   : > { %p2738_p1 = pneg %p2737_p3 }
  0x52   : > { %2358 = dma.hbm_to_vmem [thread:$0]  (!%p3144_p5), %s3873_s10, 16, %s469_s21, [#allocation17]  }
  0x53   : > { %p2745_p2 = pnand %p2744_p0, %p2738_p1 }
  0x55   : > { %2748 = shalt.err (!%p2745_p2)
}
  0x56   : > { %s3874_s2 = sld [smem:[#allocation30_spill]]  ;;  %s2974_s21 = smov [#allocation12]  }
  0x57   : > { %s435_s24 = sshll.u32 %s2974_s21, 4  ;;  %s2975_s13 = smov [#allocation15]   ;;  %s436_s24 = int_to_ptr.vmem [resolvable:$true] %s435_s24 }
  0x58   : > { %s457_s4 = sshll.u32 %s2975_s13, 4  ;;  %s2760_s14 = scalar_lea.vmem %s436_s24, 32  ;;  %s458_s4 = int_to_ptr.vmem [resolvable:$true] %s457_s4 }
  0x59   : > { %p2761_p4 = scmp.ne.s32.totalorder %s436_s24, %s2760_s14  ;;  %p2768_p9 = scmp.lt.s32.totalorder %s436_s24, %s436_s24 }
  0x5a   : > { %p2769_p10 = scmp.lt.s32.totalorder %s2760_s14, %s2760_s14 }
  0x5b   : > { %p2763_p7 = pnand %p2761_p4, %p3152_p6 }
  0x5c   : > { %2343 = dma.hbm_to_vmem [thread:$0]  (!%p3144_p5), %s3874_s2, 16, %s405_s26, [#allocation8]  }
  0x5d   : > { %p2764_p8 = pneg %p2763_p7  ;;  %p2770_p11 = por %p2769_p10, %p2768_p9 }
  0x5f   : > { %p2771_p3 = pnand %p2770_p11, %p2764_p8 }
  0x61   : > { %2774 = shalt.err (!%p2771_p3)
}
  0x62   : > { %s3875_s7 = sld [smem:[#allocation33_spill]]  ;;  %s2786_s26 = scalar_lea.vmem %s458_s4, 128 }
  0x63   : > { %p2787_p1 = scmp.ne.s32.totalorder %s458_s4, %s2786_s26  ;;  %p2794_p0 = scmp.lt.s32.totalorder %s458_s4, %s458_s4 }
  0x64   : > { %p2795_p2 = scmp.lt.s32.totalorder %s2786_s26, %s2786_s26 }
  0x65   : > { %p2789_p12 = pnand %p2787_p1, %p3152_p6 }
  0x66   : > { %p2796_p4 = por %p2795_p2, %p2794_p0 }
  0x67   : > { %p2790_p13 = pneg %p2789_p12 }
  0x68   : > { %2349 = dma.hbm_to_vmem [thread:$0]  (!%p3144_p5), %s3875_s7, 32, %s436_s24, [#allocation11]  }
  0x69   : > { %p2797_p7 = pnand %p2796_p4, %p2790_p13 }
  0x6b   : > { %2800 = shalt.err (!%p2797_p7)
}
  0x6c   : > { %s3876_s9 = sld [smem:[#allocation35_spill]]  ;;  %s2976_s21 = smov [#allocation18]  }
  0x6d   : > { %s481_s24 = sshll.u32 %s2976_s21, 4  ;;  %s482_s24 = int_to_ptr.vmem [resolvable:$true] %s481_s24 }
  0x6e   : > { %s2812_s13 = scalar_lea.vmem %s482_s24, 256  ;;  %p2820_p11 = scmp.lt.s32.totalorder %s482_s24, %s482_s24 }
  0x6f   : > { %p2813_p8 = scmp.ne.s32.totalorder %s482_s24, %s2812_s13  ;;  %p2821_p3 = scmp.lt.s32.totalorder %s2812_s13, %s2812_s13 }
  0x71   : > { %p2815_p9 = pnand %p2813_p8, %p3152_p6  ;;  %p2822_p1 = por %p2821_p3, %p2820_p11 }
  0x72   : > { %2355 = dma.hbm_to_vmem [thread:$0]  (!%p3144_p5), %s3876_s9, 128, %s458_s4, [#allocation14]  }
  0x73   : > { %p2816_p10 = pneg %p2815_p9 }
  0x75   : > { %p2823_p12 = pnand %p2822_p1, %p2816_p10 }
  0x77   : > { %2826 = shalt.err (!%p2823_p12)
}
  0x78   : > { %s2977_s14 = smov 64   ;;  %s2978_s17 = smov 4  }
  0x79   : > { %s3877_s12 = sld [smem:[#allocation38_spill]]  ;;  %s2184_s25 = sadd.s32 4294967294, %s2967_s20  }
  0x7a   : > { %s43_s26 = sadd.s32 1, %s2959_s18  ;;  %s46_s1 = sadd.s32 1, %s2963_s19 }
  0x7b   : > { %p44_p6 = scmp.ge.s32.totalorder %s43_s26, 2  ;;  %s55_s27 = sadd.s32 1, %s2947_s15 }
  0x7c   : > { %p62_p13 = scmp.ne.s32.totalorder %s2947_s15, %s2943_s30  ;;  %p63_p0 = scmp.eq.s32.totalorder %s2967_s20, 0 }
  0x7d   : > { %s3906_s26 = smov (%p44_p6, %s43_s26), 0  ;;  %s3908_s1 = smov (!%p44_p6, %s46_s1), %s2963_s19 }
  0x7e   : > { %3878 = sst [smem:[#allocation27_spill]] %s3906_s26  ;;  %s51_s21 = ssub.s32 %s2959_s18, %s3906_s26 }
  0x7f   : > { %2361 = dma.hbm_to_vmem [thread:$0]  (!%p3144_p5), %s3877_s12, 256, %s482_s24, [#allocation17], %s2977_s14, %s2977_s14, %s2978_s17  }
  0x80   : > { %p48_p2 = scmp.ge.s32.totalorder %s3908_s1, 2  ;;  %p68_p5 = scmp.ne.s32.totalorder %s2943_s30, %s2939_s29 }
  0x81   : > { %p3232_p4 = por %p63_p0, %p62_p13  ;;  %s3880_s24 = sadd.s32 4294967295, %s2967_s20  }
  0x82   : > { %p367_p7 = scmp.eq.s32.totalorder %s3880_s24, 3  ;;  %s3910_s1 = smov (%p48_p2, %s3908_s1), 0 }
  0x83   : > { %3881 = sst [smem:[#allocation28_spill]] %s3910_s1  ;;  %p3882_p8 = scmp.ne.s32.totalorder %s3866_s22, 0 }
  0x84   : > { %p3246_p10 = por %p367_p7, %p62_p13  ;;  %s50_s17 = ssub.s32 %s2963_s19, %s3910_s1 }
  0x85   : > { %p3242_p9 = por %p3882_p8, %p68_p5  ;;  %p373_p11 = scmp.eq.s32.totalorder %s2184_s25, 3 }
  0x86   : > { %s52_s4 = sor.u32 %s51_s21, %s50_s17  ;;  %p2378_p3 = scmp.lt.s32.totalorder %s2967_s20, 4 }
  0x87   : > { %p53_p1 = scmp.eq.s32.totalorder %s52_s4, 0  ;;  %p3253_p12 = por %p373_p11, %p68_p5 }
  0x88   : > { %s498_s24 = sand.u32 1, %s2947_s15   ;;  %s2243_s2 = sshll.u32 %s2963_s19, 2 }
  0x89   : > { %s3260_s5 = scalar_select %p53_p1, %s2947_s15, %s55_s27  }
  0x8a   : > { %s2195_s7 = sshll.u32 %s498_s24, 4  ;;  %s508_s8 = sadd.s32 %s2959_s18, %s2243_s2 }
  0x8b   : > { %s2198_s9 = sshll.u32 %s508_s8, 7  ;;  %s502_s10 = scalar_lea.vmem [#allocation4], %s2195_s7 }
  0x8c   : > { %s511_s12 = sshll.u32 %s502_s10, 4  ;;  %s510_s25 = scalar_lea.hbm %s3829_s0, %s2198_s9  ;;  %s512_s12 = int_to_ptr.vmem [resolvable:$true] %s511_s12 }
  0x8d   : > { %p3270_p6 = pnand %p2378_p3, %p3232_p4  ;;  %s499_s17 = scalar_lea.sflag [#allocation5], %s498_s24 }
  0x8e   : > { %s2840_s27 = scalar_lea.vmem %s512_s12, 256  ;;  %s2979_s2 = smov [#allocation4]  }
  0x8f   : > { %p2829_p13 = pneg %p3270_p6  ;;  %p2841_p0 = scmp.ne.s32.totalorder %s512_s12, %s2840_s27 }
  0x90   : > { %s2845_s7 = sshll.u32 %s2979_s2, 4  ;;  %s2846_s7 = int_to_ptr.vmem [resolvable:$false] %s2845_s7 }
  0x91   : > { %p2843_p2 = pnand %p2841_p0, %p2829_p13  ;;  %s2847_s8 = scalar_lea.vmem %s2846_s7, 512 }
  0x92   : > { %p2848_p7 = scmp.lt.s32.totalorder %s512_s12, %s2846_s7  ;;  %p2849_p8 = scmp.lt.s32.totalorder %s2847_s8, %s2840_s27 }
  0x93   : > { %p2844_p5 = pneg %p2843_p2 }
  0x94   : > { %p2850_p11 = por %p2849_p8, %p2848_p7 }
  0x96   : > { %p2851_p1 = pnand %p2850_p11, %p2844_p5 }
  0x98   : > { %2854 = shalt.err (!%p2851_p1)
}
  0x99   : > { %s2980_s9 = smov 256   ;;  %s2981_s10 = smov 128  }
  0x9a   : > { %s2982_s26 = smov 8   ;;  %p3887_p4 = scmp.ne.s32.totalorder %s3867_s23, 0 }
  0x9b   : > { %2365 = dma.hbm_to_vmem [thread:$0]  (!%p3270_p6), %s510_s25, 256, %s512_s12, %s499_s17, %s2980_s9, %s2981_s10, %s2982_s26  }
  0x9c   : > { %523 = sbr.rel (%p3887_p4) target bundleno = 2044 (0x7fc), region = 76  ;;  %s3281_s1 = sand.u32 (!%p3887_p4), 1, %s2943_s30  }
  0x9d   : > { %s2200_s28 = sshll.u32 (!%p3887_p4), %s3281_s1, 4  ;;  %s526_s4 = scalar_lea.sflag (!%p3887_p4), [#allocation5], %s3281_s1 }
  0x9e   : > { %s3285_s24 = scalar_lea.vmem (!%p3887_p4), [#allocation4], %s2200_s28 }
  0xa1   : > { %2914 = dma.done.wait (%p3242_p9), %s526_s4, 256  }
  0xa2   : > { %2916 = vsyncadd (%p3242_p9), %s526_s4, 4294967040  ;;  %p3888_p3 = scmp.ne.s32.totalorder %s3866_s22, 0 }
  0xa4   : > { %2918 = dma.done.wait (%p3888_p3), [#allocation8], 32  }
  0xa5   : > { %2920 = vsyncadd (%p3888_p3), [#allocation8], 4294967264 }
  0xa6   : > { %2922 = dma.done.wait (%p3888_p3), [#allocation11], 48  }
  0xa7   : > { %2924 = vsyncadd (%p3888_p3), [#allocation11], 4294967248 }
  0xa8   : > { %2926 = dma.done.wait (%p3888_p3), [#allocation14], 144  }
  0xa9   : > { %2928 = vsyncadd (%p3888_p3), [#allocation14], 4294967152 }
  0xaa   : > { %2930 = dma.done.wait (%p3888_p3), [#allocation17], 272  }
  0xab   : > { %2932 = vsyncadd (%p3888_p3), [#allocation17], 4294967024  ;;  %s3307_s12 = scalar_lea.vmem [#allocation19], %s2200_s28  ;;  %p2210_p9 = scmp.ne.s32.totalorder %s2951_s16, 0 }
  0xad   : > { %612 = sbr.rel (%p2210_p9) target bundleno = 180 (0xb4), region = 116 }
  0xb2   : > { %vm614_vm0 = vcmask 521216   ;;  %v2983_v0 = vmov 0.0  }
  0xb3   : > { %613 = vst [vmem:[#allocation2] sm:$0xff] %v2983_v0  ;;  %615 = vst.msk [vmem:[#allocation3] sm:$0x3f] %vm614_vm0, %v2983_v0 }
  0xb4 PF: > { %v616_v1 = vld [vmem:[%s3285_s24] sm:$0xff]  ;;  %vm619_vm1 = vcmask 261120   ;;  %v2211_v2 = vld [vmem:[%s3285_s24 + $0x8] sm:$0xff]  ;;  %v2984_v16 = vmov 0.0   ;;  %vm2985_vm2 = vmmov 0   ;;  %v2986_v39 = vmov 1  }
  0xb5   : > { %v620_v3 = vsel %vm619_vm1, %v616_v1, 0.0  ;;  %v623_v4 = vsel %vm619_vm1, %v2211_v2, 0.0  ;;  %v2527_v15 = vld [vmem:[%s3832_s3 + $0x8] sm:$0xff]   ;;  %2261 = vmatprep.subr.bf16.mxu0 %v2984_v16  ;;  %2265 = vmatprep.mubr.msk.bf16.mxu0 %vm2985_vm2, %v2984_v16  ;;  %v2528_v17 = vld [vmem:[%s3832_s3] sm:$0xff]   ;;  %v2212_v26 = vld [vmem:[#allocation7] ss:$0 sm:$0xff]  ;;  %v733_v41 = vlaneseq }
  0xb6   : > { %621 = vadd.xlane.f32.xlu0 %v620_v3  ;;  %2262 = vmatpush3.bf16.msra.mxu0 %v2527_v15  ;;  %v2213_v30 = vld [vmem:[#allocation9] ss:$0 sm:$0xff]  ;;  %v2529_v35 = vld [vmem:[%s3835_s6 + $0x18] sm:$0xff]   ;;  %v2531_v37 = vld [vmem:[%s3835_s6 + $0x8] sm:$0xff]   ;;  %v2987_v40 = vmov 0   ;;  %s3889_s4 = sld [smem:[#allocation31_spill]] }
  0xb7   : > { %2269 = vmatprep.subr.bf16.mxu1 %v2984_v16  ;;  %2263 = vmatprep.subr.bf16.mxu0 %v2984_v16  ;;  %v2530_v36 = vld [vmem:[%s3835_s6 + $0x10] sm:$0xff]   ;;  %v2532_v38 = vld [vmem:[%s3835_s6] sm:$0xff]   ;;  %v3351_v42 = vshrl.u32 %v733_v41, 7  ;;  %vm731_vm3 = vcmask 1042432   ;;  %vm781_vm4 = vcmask 518144   ;;  %vm757_vm5 = vcmask 1041408  }
  0xb8   : > { %2277 = vmatprep.mubr.msk.bf16.mxu1 %vm2985_vm2, %v2984_v16  ;;  %2270 = vmatpush3.bf16.msra.mxu1 %v2529_v35  ;;  %vm773_vm6 = vcmask 1040384   ;;  %vm821_vm7 = vcmask 1044480   ;;  %vm886_vm8 = vcmask 523264   ;;  %s2997_s22 = smov 64   ;;  %vm1439_vm9 = vcmask 1043456   ;;  %s3890_s25 = sld [smem:[#allocation37_spill]] }
  0xb9   : > { %2271 = vmatprep.subr.bf16.mxu1 %v2984_v16  ;;  %2494 = vset.pattern.permute.xlu1 %v2986_v39  ;;  %v3354_v43 = vsub.s32 1, %v3351_v42  ;;  %v3357_v44 = vsub.s32 2, %v3351_v42  ;;  %v3363_v46 = vsub.s32 0, %v3351_v42  ;;  %v3366_v47 = vsub.s32 3, %v3351_v42  ;;  %s3893_s26 = sld [smem:[#allocation39_spill]]  ;;  %s2019_s13 = sshll.u32 %s3307_s12, 4  ;;  %s3768_s13 = int_to_ptr.vmem [resolvable:$true] %s2019_s13 }
  0xba   : > { %624 = vadd.xlane.f32.xlu0 %v623_v4  ;;  %2264 = vmatpush3.bf16.msra.mxu0 %v2528_v17  ;;  %v727_v51 = vld [vmem:[#allocation3] sm:$0x7]  ;;  %v783_v63 = vld [vmem:[#allocation3 + $0x3] sm:$0x7]  ;;  %s3894_s28 = sld [smem:[#allocation26_spill]]  ;;  %s2855_s8 = scalar_lea.vmem %s3768_s13, 256 }
  0xbb   : > { %2281 = vmatprep.subr.bf16.mxu0 %v2984_v16  ;;  %2493 = vset.pattern.permute.xlu0 %v2987_v40  ;;  %s3895_s2 = sld [smem:[#allocation40_spill]]  ;;  %p2856_p6 = scmp.ne.s32.totalorder %s3768_s13, %s2855_s8 }
  0xbc   : > { %2272 = vmatpush3.bf16.msra.mxu1 %v2530_v36  ;;  %v726_v45 = vld [vmem:[%s3889_s4] sm:$0xf]  ;;  %v2217_v36 = vld [vmem:[#allocation10] ss:$0 sm:$0xff]  ;;  %s3007_s4 = smov 96   ;;  %s3008_s9 = smov [#allocation19]  }
  0xbd   : > { %2273 = vmatprep.subr.bf16.mxu1 %v2984_v16  ;;  %v752_v48 = vrot.slane %v726_v45, %v3354_v43  ;;  %v768_v49 = vrot.slane %v726_v45, %v3357_v44  ;;  %v742_v52 = vrot.slane %v726_v45, %v3363_v46  ;;  %v736_v54 = vrot.slane %v726_v45, %v3366_v47  ;;  %p2857_p13 = pnand %p2856_p6, %p3246_p10  ;;  %s2859_s10 = sshll.u32 %s3008_s9, 4  ;;  %s2860_s10 = int_to_ptr.vmem [resolvable:$false] %s2859_s10 }
  0xbe   : > { %p2862_p2 = scmp.lt.s32.totalorder %s3768_s13, %s2860_s10 }
  0xbf   : > { %p2858_p0 = pneg %p2857_p13 }
  0xc0   : > { %2274 = vmatpush3.bf16.msra.mxu1 %v2531_v37 }
  0xc1   : > { %2275 = vmatprep.subr.bf16.mxu1 %v2984_v16 }
  0xc4   : > { %2276 = vmatpush3.bf16.msra.mxu1 %v2532_v38 }
  0xc5   : > { %2293 = vmatprep.subr.bf16.mxu1 %v2984_v16 }
 0x13f   : > { %v622_v5 = vpop.xlane.xlu0 %621 }
 0x140   : > { %v627_v6 = vmul.f32 0.03125, %v622_v5 }
 0x142   : > { %v629_v7 = vsub.f32 %v616_v1, %v627_v6 }
 0x143   : > { %v625_v8 = vpop.xlane.xlu0 %624 }
 0x144   : > { %v628_v9 = vmul.f32 0.03125, %v625_v8  ;;  %v631_v10 = vmul.f32 %v629_v7, %v629_v7 }
 0x146   : > { %v630_v11 = vsub.f32 %v2211_v2, %v628_v9  ;;  %v633_v12 = vsel %vm619_vm1, %v631_v10, 0.0 }
 0x147   : > { %634 = vadd.xlane.f32.xlu1 %v633_v12 }
 0x148   : > { %v632_v13 = vmul.f32 %v630_v11, %v630_v11 }
 0x14a   : > { %v636_v14 = vsel %vm619_vm1, %v632_v13, 0.0 }
 0x14b   : > { %637 = vadd.xlane.f32.xlu1 %v636_v14 }
 0x1d0   : > { %v635_v18 = vpop.xlane.xlu1 %634 }
 0x1d1   : > { %v639_v19 = vmul.f32 0.03125, %v635_v18 }
 0x1d3   : > { %v641_v20 = vadd.f32 1e-05, %v639_v19 }
 0x1d4   : > { %v638_v21 = vpop.xlane.xlu1 %637 }
 0x1d5   : > { %2539 = vrsqrt.f32 %v641_v20  ;;  %v640_v22 = vmul.f32 0.03125, %v638_v21 }
 0x1d7   : > { %v642_v23 = vadd.f32 1e-05, %v640_v22 }
 0x1d9   : > { %2541 = vrsqrt.f32 %v642_v23 }
 0x1e2   : > { %v2540_v24 = vpop.eup %2539 }
 0x1e3   : > { %v645_v25 = vmul.f32 %v2540_v24, %v629_v7 }
 0x1e5   : > { %v654_v29 = vmul.f32 %v2212_v26, %v645_v25 }
 0x1e6   : > { %v2542_v27 = vpop.eup %2541 }
 0x1e7   : > { %v646_v28 = vmul.f32 %v2542_v27, %v630_v11  ;;  %v663_v32 = vadd.f32 %v2213_v30, %v654_v29 }
 0x1e9   : > { %v655_v31 = vmul.f32 %v2212_v26, %v646_v28 }
 0x1eb   : > { %v664_v33 = vadd.f32 %v2213_v30, %v655_v31 }
 0x1ed   : > { %v665_v34 = vpack.c.bf16 %v664_v33, %v663_v32 }
 0x1ef   : > { %2266 = vmatmul.mubr.msk.bf16.vlgmr.msra.gmra.mxu0 %vm619_vm1, %v665_v34 }
 0x1f0   : > { %2289 = vmatprep.mubr.msk.bf16.mxu0 %vm2985_vm2, %v2984_v16 }
 0x2af   : > { %v3370_v50 = vpop.f32.mrf.mxu0 }
 0x2b0   : > { %v729_v53 = vrot.slane %v3370_v50, 5 }
 0x2b1   : > { %v2267_v55 = vpop.f32.mrf.mxu0 }
 0x2b2   : > { %v732_v56 = vsel %vm731_vm3, %v727_v51, %v729_v53  ;;  %v754_v57 = vmul.f32 %v752_v48, %v729_v53  ;;  %v770_v58 = vmul.f32 %v768_v49, %v729_v53  ;;  %782 = vst.msk [vmem:[#allocation3] sm:$0x7] %vm781_vm4, %v729_v53  ;;  %v738_v3 = vmul.f32 %v736_v54, %v729_v53 }
 0x2b3   : > { %v743_v59 = vmul.f32 %v742_v52, %v732_v56  ;;  %v753_v60 = vmul.f32 %v752_v48, %v732_v56  ;;  %v769_v61 = vmul.f32 %v768_v49, %v732_v56  ;;  %v3377_v62 = vpop.f32.mrf.mxu0  ;;  %v737_v2 = vmul.f32 %v736_v54, %v732_v56 }
 0x2b4   : > { %v759_v0 = vrot.slane %v754_v57, 6  ;;  %v785_v1 = vrot.slane %v3377_v62, 5  ;;  %v775_v8 = vrot.slane %v770_v58, 7 }
 0x2b5   : > { %v745_v4 = vrot.slane %v743_v59, 5  ;;  %v758_v5 = vrot.slane %v753_v60, 6  ;;  %v2268_v6 = vpop.f32.mrf.mxu0  ;;  %v774_v7 = vrot.slane %v769_v61, 7 }
 0x2b6   : > { %v787_v9 = vsel %vm731_vm3, %v783_v63, %v785_v1  ;;  %v797_v10 = vmul.f32 %v785_v1, %v752_v48  ;;  %818 = vst.msk [vmem:[#allocation3 + $0x3] sm:$0x7] %vm781_vm4, %v785_v1  ;;  %v789_v20 = vmul.f32 %v785_v1, %v736_v54  ;;  %v808_v21 = vmul.f32 %v785_v1, %v768_v49 }
 0x2b7   : > { %v747_v11 = vadd.f32 %v745_v4, %v737_v2  ;;  %v748_v12 = vadd.f32 %v745_v4, %v738_v3  ;;  %v760_v13 = vsel %vm757_vm5, %v758_v5, %v759_v0  ;;  %v790_v14 = vmul.f32 %v787_v9, %v742_v52 }
 0x2b8   : > { %v796_v15 = vmul.f32 %v787_v9, %v752_v48  ;;  %v801_v17 = vrot.slane %v797_v10, 6  ;;  %v807_v18 = vmul.f32 %v787_v9, %v768_v49  ;;  %v788_v23 = vmul.f32 %v787_v9, %v736_v54 }
 0x2b9   : > { %v764_v19 = vadd.f32 %v760_v13, %v748_v12  ;;  %v763_v22 = vadd.f32 %v758_v5, %v747_v11  ;;  %v792_v24 = vrot.slane %v790_v14, 5  ;;  %v776_v26 = vsel %vm773_vm6, %v774_v7, %v775_v8 }
 0x2ba   : > { %v800_v25 = vrot.slane %v796_v15, 6  ;;  %v811_v27 = vrot.slane %v807_v18, 7  ;;  %v812_v28 = vrot.slane %v808_v21, 7  ;;  %v2988_v9 = vmov 7   ;;  %v2223_v18 = vld [vmem:[#allocation12] ss:$0 sm:$0xff] }
 0x2bb   : > { %v779_v29 = vadd.f32 %v774_v7, %v763_v22  ;;  %v780_v30 = vadd.f32 %v776_v26, %v764_v19  ;;  %v794_v31 = vadd.f32 %v792_v24, %v788_v23  ;;  %v795_v32 = vadd.f32 %v792_v24, %v789_v20  ;;  %v2225_v19 = vld [vmem:[#allocation12 + $0x1] ss:$0 sm:$0xff]  ;;  %v2224_v21 = vld [vmem:[#allocation13] ss:$0 sm:$0xff] }
 0x2bc   : > { %v802_v33 = vsel %vm757_vm5, %v800_v25, %v801_v17  ;;  %v813_v41 = vsel %vm773_vm6, %v811_v27, %v812_v28  ;;  %v2989_v11 = vmov 2   ;;  %v2990_v12 = vmov 6  }
 0x2bd   : > { %v822_v34 = vrot.slane %v779_v29, 3  ;;  %v823_v35 = vrot.slane %v780_v30, 3  ;;  %v806_v37 = vadd.f32 %v802_v33, %v795_v32  ;;  %v805_v38 = vadd.f32 %v800_v25, %v794_v31 }
 0x2be   : > { %v2991_v13 = vmov 3   ;;  %v2993_v14 = vmov 5   ;;  %v2995_v15 = vmov 9   ;;  %v2996_v17 = vmov 11  }
 0x2bf   : > { %v824_v45 = vsel %vm821_vm7, %v822_v34, %v823_v35  ;;  %v816_v48 = vadd.f32 %v811_v27, %v805_v38  ;;  %v817_v49 = vadd.f32 %v813_v41, %v806_v37  ;;  %v992_v37 = vld [vmem:[#allocation15] sm:$0xff] }
 0x2c0   : > { %v839_v51 = vadd.f32 %v2217_v36, %v824_v45  ;;  %v993_v41 = vmul.f32 1.442695, %v992_v37 }
 0x2c1   : > { %v828_v52 = vrot.slane %v816_v48, 3  ;;  %v829_v53 = vrot.slane %v817_v49, 3 }
 0x2c2   : > { %v841_v54 = vsub.f32 0.0, %v839_v51 }
 0x2c3   : > { %v830_v55 = vsel %vm821_vm7, %v828_v52, %v829_v53 }
 0x2c4   : > { %v843_v56 = vmul.f32 1.442695, %v841_v54  ;;  %v840_v57 = vadd.f32 %v2217_v36, %v830_v55 }
 0x2c6   : > { %v842_v58 = vsub.f32 0.0, %v840_v57  ;;  %2543 = vpow2.f32 %v843_v56 }
 0x2c8   : > { %v845_v59 = vmul.f32 1.442695, %v842_v58 }
 0x2ca   : > { %2545 = vpow2.f32 %v845_v59 }
 0x2d3   : > { %v2544_v60 = vpop.eup %2543 }
 0x2d4   : > { %v847_v61 = vadd.f32 1.0, %v2544_v60 }
 0x2d6   : > { %2547 = vrcp.f32 %v847_v61 }
 0x2d7   : > { %v2546_v63 = vpop.eup %2545 }
 0x2d8   : > { %v848_v0 = vadd.f32 1.0, %v2546_v63 }
 0x2da   : > { %2549 = vrcp.f32 %v848_v0 }
 0x2e3   : > { %v2548_v1 = vpop.eup %2547 }
 0x2e4   : > { %v3386_v3 = vmul.f32 %v2548_v1, %v839_v51 }
 0x2e7   : > { %v2550_v2 = vpop.eup %2549 }
 0x2e8   : > { %v3388_v4 = vmul.f32 %v2550_v2, %v840_v57  ;;  %v1061_v57 = vsub.s32 5, %v3351_v42 }
 0x2ea   : > { %v853_v5 = vpack.c.bf16 %v3388_v4, %v3386_v3 }
 0x2ec   : > { %2278 = vmatmul.mubr.msk.bf16.vlgmr.msra.gmra.mxu1 %vm886_vm8, %v853_v5 }
 0x2ed   : > { %2297 = vmatprep.mubr.msk.bf16.mxu1 %vm2985_vm2, %v2984_v16 }
 0x3ac   : > { %v3395_v6 = vpop.f32.mrf.mxu1 }
 0x3ad   : > { %959 = vperm.xlu1 %2494, %v3395_v6   ;;  %934 = vperm.xlu0 %2493, %v3395_v6  }
 0x3ae   : > { %v2279_v7 = vpop.f32.mrf.mxu1 }
 0x3b0   : > { %v3399_v8 = vpop.f32.mrf.mxu1 }
 0x3b1   : > { %2495 = vset.pattern.permute.xlu1 %v2987_v40  ;;  %2502 = vset.pattern.permute.xlu0 %v2988_v9  ;;  %v2992_v40 = vmov 4  }
 0x3b2   : > { %1139 = vperm.xlu0 %2502, %v3399_v8   ;;  %939 = vperm.xlu1 %2495, %v3399_v8   ;;  %v2280_v10 = vpop.f32.mrf.mxu1 }
 0x3b6   : > { %2504 = vset.pattern.permute.xlu0 %v2989_v11  ;;  %2496 = vset.pattern.permute.xlu1 %v2986_v39  ;;  %v2994_v39 = vmov 8  }
 0x3b7   : > { %1007 = vperm.xlu0 %2504, %v3395_v6   ;;  %963 = vperm.xlu1 %2496, %v3399_v8  }
 0x3bb   : > { %2506 = vset.pattern.permute.xlu0 %v2990_v12  ;;  %2497 = vset.pattern.permute.xlu1 %v2991_v13 }
 0x3bc   : > { %1055 = vperm.xlu0 %2506, %v3395_v6   ;;  %1019 = vperm.xlu1 %2497, %v3395_v6  }
 0x3c0   : > { %2509 = vset.pattern.permute.xlu0 %v2992_v40  ;;  %2498 = vset.pattern.permute.xlu1 %v2993_v14 }
 0x3c1   : > { %1115 = vperm.xlu0 %2509, %v3399_v8   ;;  %1043 = vperm.xlu1 %2498, %v3395_v6  }
 0x3c5   : > { %2511 = vset.pattern.permute.xlu0 %v2994_v39  ;;  %2499 = vset.pattern.permute.xlu1 %v2988_v9 }
 0x3c6   : > { %1147 = vperm.xlu0 %2511, %v3399_v8   ;;  %1067 = vperm.xlu1 %2499, %v3395_v6  }
 0x3ca   : > { %2500 = vset.pattern.permute.xlu1 %v2991_v13  ;;  %2512 = vset.pattern.permute.xlu0 %v2996_v17 }
 0x3cb   : > { %1107 = vperm.xlu1 %2500, %v3399_v8  }
 0x3cf   : > { %2501 = vset.pattern.permute.xlu1 %v2993_v14 }
 0x3d0   : > { %1123 = vperm.xlu1 %2501, %v3399_v8  }
 0x3d4   : > { %2503 = vset.pattern.permute.xlu1 %v2995_v15 }
 0x3d5   : > { %1091 = vperm.xlu1 %2503, %v3395_v6  }
 0x3d9   : > { %1155 = vperm.xlu1 %2503, %v3399_v8  }
 0x3dd   : > { %2505 = vset.pattern.permute.xlu1 %v2992_v40 }
 0x3de   : > { %1031 = vperm.xlu1 %2505, %v3395_v6  }
 0x3e2   : > { %2507 = vset.pattern.permute.xlu1 %v2994_v39 }
 0x3e3   : > { %1079 = vperm.xlu1 %2507, %v3395_v6  }
 0x3e7   : > { %2508 = vset.pattern.permute.xlu1 %v2989_v11 }
 0x3e8   : > { %1099 = vperm.xlu1 %2508, %v3399_v8  }
 0x3ec   : > { %2510 = vset.pattern.permute.xlu1 %v2990_v12 }
 0x3ed   : > { %1131 = vperm.xlu1 %2510, %v3399_v8  }
 0x3f1   : > { %2513 = vset.pattern.permute.xlu1 %v2996_v17 }
 0x428   : > { %v960_v20 = vpop.permute.xlu1 %959  ;;  %v935_v22 = vpop.permute.xlu0 %934 }
 0x429   : > { %v946_v23 = vmul.f32 %v2223_v18, %v935_v22  ;;  %v970_v24 = vmul.f32 %v2225_v19, %v960_v20 }
 0x42b   : > { %v955_v25 = vadd.f32 %v2224_v21, %v946_v23 }
 0x42d   : > { %v972_v26 = vadd.f32 %v970_v24, %v955_v25  ;;  %v940_v27 = vpop.permute.xlu1 %939 }
 0x42e   : > { %v947_v29 = vmul.f32 %v2223_v18, %v940_v27  ;;  %v3852_v18 = vsub.s32 7, %v3351_v42 }
 0x42f   : > { %v976_v28 = vand.u32 2147483647, %v972_v26  ;;  %v974_v60 = vmax.f32 %v972_v26, 0.0 }
 0x430   : > { %v956_v33 = vadd.f32 %v2224_v21, %v947_v29  ;;  %v1140_v29 = vpop.permute.xlu0 %1139 }
 0x431   : > { %v978_v30 = vsub.f32 0.0, %v976_v28 }
 0x432   : > { %v964_v31 = vpop.permute.xlu1 %963 }
 0x433   : > { %v980_v32 = vmul.f32 1.442695, %v978_v30  ;;  %v971_v34 = vmul.f32 %v2225_v19, %v964_v31 }
 0x435   : > { %2551 = vpow2.f32 %v980_v32  ;;  %v973_v35 = vadd.f32 %v971_v34, %v956_v33 }
 0x437   : > { %v977_v36 = vand.u32 2147483647, %v973_v35  ;;  %v1020_v51 = vpop.permute.xlu1 %1019  ;;  %v975_v39 = vmax.f32 %v973_v35, 0.0 }
 0x439   : > { %v979_v38 = vsub.f32 0.0, %v977_v36 }
 0x43b   : > { %v982_v45 = vmul.f32 1.442695, %v979_v38 }
 0x43c   : > { %v1044_v55 = vpop.permute.xlu1 %1043 }
 0x43d   : > { %2553 = vpow2.f32 %v982_v45 }
 0x43e   : > { %2555 = vpow2.f32 %v993_v41 }
 0x441   : > { %v1068_v0 = vpop.permute.xlu1 %1067 }
 0x442   : > { %v2552_v48 = vpop.eup %2551 }
 0x443   : > { %v984_v49 = vadd.f32 1.0, %v2552_v48 }
 0x445   : > { %2557 = vlog2.f32 %v984_v49 }
 0x446   : > { %v1108_v40 = vpop.permute.xlu1 %1107 }
 0x44a   : > { %v2554_v52 = vpop.eup %2553 }
 0x44b   : > { %v985_v53 = vadd.f32 1.0, %v2554_v52  ;;  %v2556_v54 = vpop.eup %2555  ;;  %v1124_v24 = vpop.permute.xlu1 %1123 }
 0x44c   : > { %v3421_v56 = vsub.f32 0.0, %v2556_v54 }
 0x44d   : > { %2559 = vlog2.f32 %v985_v53 }
 0x44e   : > { %v1014_v59 = vrot.slane %v3421_v56, %v3354_v43  ;;  %v1062_v63 = vrot.slane %v3421_v56, %v1061_v57  ;;  %v1038_v1 = vrot.slane %v3421_v56, %v3366_v47  ;;  %v1086_v25 = vrot.slane %v3421_v56, %v3852_v18 }
 0x450   : > { %v1092_v38 = vpop.permute.xlu1 %1091 }
 0x452   : > { %v2558_v58 = vpop.eup %2557 }
 0x453   : > { %v987_v61 = vmul.f32 0.6931472, %v2558_v58 }
 0x454   : > { %v1156_v49 = vpop.permute.xlu1 %1155 }
 0x455   : > { %v3431_v2 = vadd.f32 %v987_v61, %v974_v60 }
 0x457   : > { %v3435_v5 = vmul.f32 %v3431_v2, %v3386_v3  ;;  %v1063_v7 = vmul.f32 %v1062_v63, %v3431_v2  ;;  %v1015_v9 = vmul.f32 %v1014_v59, %v3431_v2  ;;  %v1039_v11 = vmul.f32 %v1038_v1, %v3431_v2 }
 0x458   : > { %v1087_v30 = vmul.f32 %v1086_v25, %v3431_v2 }
 0x459   : > { %v1022_v10 = vmul.f32 %v1020_v51, %v3435_v5  ;;  %v1070_v13 = vmul.f32 %v1068_v0, %v3435_v5  ;;  %v1064_v14 = vmul.f32 1.442695, %v1063_v7  ;;  %v1016_v17 = vmul.f32 1.442695, %v1015_v9 }
 0x45a   : > { %v2560_v12 = vpop.eup %2559  ;;  %v1046_v20 = vmul.f32 %v1044_v55, %v3435_v5  ;;  %v1040_v21 = vmul.f32 1.442695, %v1039_v11  ;;  %v1088_v33 = vmul.f32 1.442695, %v1087_v30  ;;  %v1094_v54 = vmul.f32 %v1092_v38, %v3435_v5  ;;  %v1032_v11 = vpop.permute.xlu1 %1031 }
 0x45b   : > { %v989_v15 = vmul.f32 0.6931472, %v2560_v12  ;;  %1200 = vrot.lane.b32.xlu1 %v1022_v10, %s2997_s22  ;;  %1208 = vrot.lane.b32.xlu0 %v1070_v13, %s2997_s22  ;;  %2561 = vpow2.f32 %v1064_v14  ;;  %v3000_v0 = vmov 15   ;;  %v3002_v7 = vmov 14  }
 0x45c   : > { %2563 = vpow2.f32 %v1016_v17  ;;  %v3003_v9 = vmov 16   ;;  %v3004_v10 = vmov 12   ;;  %v1757_v12 = vsub.f32 0.0, %v3370_v50 }
 0x45d   : > { %v3445_v19 = vadd.f32 %v989_v15, %v975_v39  ;;  %2565 = vpow2.f32 %v1040_v21  ;;  %v1758_v13 = vsub.f32 0.0, %v3377_v62  ;;  %v1049_v17 = vsub.s32 4, %v3351_v42 }
 0x45e   : > { %v1759_v14 = vmul.f32 1.442695, %v1757_v12  ;;  %v1080_v39 = vpop.permute.xlu1 %1079  ;;  %v1034_v12 = vmul.f32 %v1032_v11, %v3435_v5 }
 0x45f   : > { %v3450_v22 = vmul.f32 %v3445_v19, %v3388_v4  ;;  %1204 = vrot.lane.b32.xlu1 %v1046_v20, %s2997_s22  ;;  %v1103_v23 = vmul.f32 %v1014_v59, %v3445_v19  ;;  %v1119_v32 = vmul.f32 %v1038_v1, %v3445_v19  ;;  %v1135_v36 = vmul.f32 %v1062_v63, %v3445_v19 }
 0x460   : > { %v1151_v45 = vmul.f32 %v1086_v25, %v3445_v19  ;;  %v2998_v59 = vmov 13   ;;  %v2999_v63 = vmov 17   ;;  %v3001_v1 = vmov 10  }
 0x461   : > { %v1110_v26 = vmul.f32 %v1108_v40, %v3450_v22  ;;  %v1126_v27 = vmul.f32 %v1124_v24, %v3450_v22  ;;  %v1104_v28 = vmul.f32 1.442695, %v1103_v23  ;;  %v1142_v31 = vmul.f32 %v1140_v29, %v3450_v22  ;;  %v1008_v40 = vpop.permute.xlu0 %1007 }
 0x462   : > { %v1120_v35 = vmul.f32 1.442695, %v1119_v32  ;;  %v1136_v41 = vmul.f32 1.442695, %v1135_v36  ;;  %v1158_v52 = vmul.f32 %v1156_v49, %v3450_v22  ;;  %v1152_v53 = vmul.f32 1.442695, %v1151_v45 }
 0x463   : > { %1216 = vrot.lane.b32.xlu1 %v1110_v26, %s2997_s22  ;;  %1220 = vrot.lane.b32.xlu0 %v1126_v27, %s2997_s22  ;;  %2567 = vpow2.f32 %v1104_v28  ;;  %v1761_v15 = vmul.f32 1.442695, %v1758_v13  ;;  %v1100_v21 = vpop.permute.xlu1 %1099  ;;  %v1050_v23 = vrot.slane %v3421_v56, %v1049_v17  ;;  %v1026_v25 = vrot.slane %v3421_v56, %v3357_v44 }
 0x464   : > { %2569 = vpow2.f32 %v1088_v33  ;;  %v1073_v28 = vsub.s32 6, %v3351_v42 }
 0x465   : > { %2571 = vpow2.f32 %v1120_v35  ;;  %v1056_v20 = vpop.permute.xlu0 %1055  ;;  %v1051_v24 = vmul.f32 %v1050_v23, %v3431_v2  ;;  %v1027_v32 = vmul.f32 %v1026_v25, %v3431_v2 }
 0x466   : > { %2573 = vpow2.f32 %v1136_v41  ;;  %v1074_v33 = vrot.slane %v3421_v56, %v1073_v28 }
 0x467   : > { %1224 = vrot.lane.b32.xlu1 %v1142_v31, %s2997_s22  ;;  %2575 = vpow2.f32 %v1152_v53  ;;  %v1052_v30 = vmul.f32 1.442695, %v1051_v24  ;;  %v1028_v41 = vmul.f32 1.442695, %v1027_v32 }
 0x468   : > { %v2562_v34 = vpop.eup %2561  ;;  %2577 = vpow2.f32 %v1759_v14  ;;  %v1132_v29 = vpop.permute.xlu1 %1131  ;;  %v1075_v45 = vmul.f32 %v1074_v33, %v3431_v2 }
 0x469   : > { %v2564_v37 = vpop.eup %2563  ;;  %1168 = vrot.lane.b32.xlu0 %v2562_v34, %s2997_s22  ;;  %2579 = vpow2.f32 %v1761_v15  ;;  %v1116_v26 = vpop.permute.xlu0 %1115  ;;  %v1134_v11 = vmul.f32 %v1132_v29, %v3450_v22 }
 0x46a   : > { %v2566_v48 = vpop.eup %2565  ;;  %2581 = vpow2.f32 %v1052_v30  ;;  %v3535_v30 = vld [vmem:[#allocation2] sm:$0xff] }
 0x46b   : > { %1160 = vrot.lane.b32.xlu1 %v2564_v37, %s2997_s22  ;;  %v3551_v32 = vrot.slane %v3535_v30, %v1061_v57 }
 0x46d   : > { %v1148_v36 = vpop.permute.xlu0 %1147 }
 0x46f   : > { %1164 = vrot.lane.b32.xlu1 %v2566_v48, %s2997_s22 }
 0x470   : > { %v2568_v51 = vpop.eup %2567 }
 0x471   : > { %1176 = vrot.lane.b32.xlu0 %v2568_v51, %s2997_s22  ;;  %v2570_v55 = vpop.eup %2569  ;;  %v1111_v51 = vmul.f32 %v1026_v25, %v3445_v19  ;;  %v1102_v25 = vmul.f32 %v1100_v21, %v3450_v22 }
 0x472   : > { %v2572_v58 = vpop.eup %2571 }
 0x473   : > { %1228 = vrot.lane.b32.xlu1 %v1158_v52, %s2997_s22  ;;  %v2574_v60 = vpop.eup %2573 }
 0x474   : > { %v2576_v61 = vpop.eup %2575 }
 0x475   : > { %1212 = vrot.lane.b32.xlu0 %v1094_v54, %s2997_s22  ;;  %v2578_v35 = vpop.eup %2577  ;;  %v1127_v54 = vmul.f32 %v1050_v23, %v3445_v19  ;;  %v3525_v23 = vmul.f32 %v1148_v36, %v3450_v22 }
 0x476   : > { %v2580_v37 = vpop.eup %2579  ;;  %v1763_v48 = vadd.f32 1.0, %v2578_v35 }
 0x477   : > { %1630 = vperm.xlu1 %2513, %v3399_v8   ;;  %v1764_v52 = vadd.f32 1.0, %v2580_v37  ;;  %v2582_v21 = vpop.eup %2581 }
 0x479   : > { %1172 = vrot.lane.b32.xlu0 %v2570_v55, %s2997_s22  ;;  %v1058_v55 = vmul.f32 %v1056_v20, %v3435_v5  ;;  %v1118_v20 = vmul.f32 %v1116_v26, %v3450_v22  ;;  %v3540_v26 = vrot.slane %v3535_v30, %v1049_v17 }
 0x47b   : > { %1180 = vrot.lane.b32.xlu1 %v2572_v58, %s2997_s22 }
 0x47c   : > { %2514 = vset.pattern.permute.xlu1 %v2998_v59 }
 0x47d   : > { %1567 = vperm.xlu0 %2512, %v3395_v6  }
 0x47f   : > { %1184 = vrot.lane.b32.xlu1 %v2574_v60, %s2997_s22  ;;  %v1076_v60 = vmul.f32 1.442695, %v1075_v45 }
 0x481   : > { %2515 = vset.pattern.permute.xlu0 %v2998_v59  ;;  %v1143_v59 = vmul.f32 %v1074_v33, %v3445_v19 }
 0x482   : > { %1646 = vperm.xlu0 %2515, %v3399_v8  }
 0x483   : > { %1188 = vrot.lane.b32.xlu1 %v2576_v61, %s2997_s22  ;;  %v3005_v61 = vmov 1966171168   ;;  %v1144_v13 = vmul.f32 1.442695, %v1143_v59 }
 0x486   : > { %2517 = vset.pattern.permute.xlu0 %v2999_v63 }
 0x487   : > { %1583 = vperm.xlu1 %2514, %v3395_v6   ;;  %1615 = vperm.xlu0 %2517, %v3395_v6  }
 0x48b   : > { %2516 = vset.pattern.permute.xlu1 %v3000_v0  ;;  %2520 = vset.pattern.permute.xlu0 %v3001_v1  ;;  %v1700_v0 = vunpack.c.l.s4 %v3005_v61 }
 0x48c   : > { %1599 = vperm.xlu1 %2516, %v3395_v6   ;;  %1625 = vperm.xlu0 %2520, %v3399_v8  }
 0x48d   : > { %v1701_v15 = vunpack.c.0.s8 %v1700_v0 }
 0x48f   : > { %v3554_v17 = vsub.s32 %v1701_v15, %v3351_v42 }
 0x490   : > { %1662 = vperm.xlu1 %2516, %v3399_v8   ;;  %2522 = vset.pattern.permute.xlu0 %v3002_v7 }
 0x491   : > { %1593 = vperm.xlu0 %2522, %v3395_v6  }
 0x494   : > { %2518 = vset.pattern.permute.xlu1 %v2999_v63 }
 0x495   : > { %1678 = vperm.xlu1 %2518, %v3399_v8   ;;  %2525 = vset.pattern.permute.xlu0 %v3003_v9 }
 0x499   : > { %2519 = vset.pattern.permute.xlu1 %v3001_v1 }
 0x49a   : > { %1562 = vperm.xlu1 %2519, %v3395_v6  }
 0x49e   : > { %2521 = vset.pattern.permute.xlu1 %v3004_v10  ;;  %v1128_v10 = vmul.f32 1.442695, %v1127_v54 }
 0x49f   : > { %1577 = vperm.xlu1 %2521, %v3395_v6  }
 0x4a3   : > { %1640 = vperm.xlu1 %2521, %v3399_v8  }
 0x4a7   : > { %2523 = vset.pattern.permute.xlu1 %v3002_v7 }
 0x4a8   : > { %1656 = vperm.xlu1 %2523, %v3399_v8  }
 0x4ac   : > { %2524 = vset.pattern.permute.xlu1 %v3003_v9  ;;  %v1112_v9 = vmul.f32 1.442695, %v1111_v51 }
 0x4ad   : > { %1609 = vperm.xlu1 %2524, %v3395_v6   ;;  %v1002_v6 = vrot.slane %v3421_v56, %v3363_v46  ;;  %v1010_v56 = vmul.f32 %v1008_v40, %v3435_v5 }
 0x4af   : > { %v1003_v27 = vmul.f32 %v1002_v6, %v3431_v2  ;;  %v1095_v38 = vmul.f32 %v1002_v6, %v3445_v19  ;;  %v3528_v6 = vmul.f32 %v1080_v39, %v3435_v5  ;;  %v1508_v5 = vrot.slane %v3535_v30, %v3363_v46 }
 0x4b0   : > { %v1512_v39 = vrot.slane %v3535_v30, %v3354_v43 }
 0x4b1   : > { %v1004_v31 = vmul.f32 1.442695, %v1003_v27  ;;  %v1096_v58 = vmul.f32 1.442695, %v1095_v38 }
 0x4b3   : > { %2583 = vpow2.f32 %v1004_v31 }
 0x4b4   : > { %2585 = vpow2.f32 %v1028_v41 }
 0x4b5   : > { %2587 = vrcp.f32 %v1763_v48 }
 0x4b6   : > { %2589 = vrcp.f32 %v1764_v52  ;;  %v1520_v52 = vrot.slane %v3535_v30, %v3366_v47 }
 0x4b7   : > { %2591 = vpow2.f32 %v1096_v58 }
 0x4b8   : > { %2593 = vpow2.f32 %v1076_v60 }
 0x4b9   : > { %2595 = vpow2.f32 %v1112_v9 }
 0x4ba   : > { %2597 = vpow2.f32 %v1128_v10 }
 0x4bb   : > { %2599 = vpow2.f32 %v1144_v13 }
 0x4c0   : > { %v2584_v33 = vpop.eup %2583 }
 0x4c1   : > { %v2586_v59 = vpop.eup %2585 }
 0x4c2   : > { %v3577_v10 = vpop.eup %2587 }
 0x4cd   : > { %v1201_v34 = vpop.permute.xlu1 %1200  ;;  %v1209_v53 = vpop.permute.xlu0 %1208 }
 0x4ce   : > { %v1233_v2 = vsel %vm886_vm8, %v1058_v55, %v1209_v53  ;;  %v1231_v1 = vsel %vm886_vm8, %v1010_v56, %v1201_v34 }
 0x4cf   : > { %v1281_v40 = vrot.slane %v1233_v2, 7  ;;  %v1279_v14 = vrot.slane %v1231_v1, 7 }
 0x4d1   : > { %v1205_v49 = vpop.permute.xlu1 %1204  ;;  %v1297_v22 = vsel %vm773_vm6, 0.0, %v1281_v40  ;;  %v1295_v29 = vsel %vm773_vm6, 0.0, %v1279_v14 }
 0x4d2   : > { %v3533_v27 = vsel %vm886_vm8, %v1034_v12, %v1205_v49 }
 0x4d3   : > { %v1280_v34 = vrot.slane %v3533_v27, 7 }
 0x4d5   : > { %v1217_v7 = vpop.permute.xlu1 %1216  ;;  %v1221_v19 = vpop.permute.xlu0 %1220  ;;  %v1296_v12 = vsel %vm773_vm6, 0.0, %v1280_v34 }
 0x4d6   : > { %v3558_v35 = vsel %vm886_vm8, %v1118_v20, %v1221_v19  ;;  %v3561_v36 = vsel %vm886_vm8, %v1102_v25, %v1217_v7  ;;  %v3581_v19 = vpop.eup %2589 }
 0x4d7   : > { %v1284_v54 = vrot.slane %v3558_v35, 7  ;;  %v1283_v56 = vrot.slane %v3561_v36, 7  ;;  %v2592_v25 = vpop.eup %2591 }
 0x4d9   : > { %v1225_v24 = vpop.permute.xlu1 %1224 }
 0x4da   : > { %v3565_v41 = vsel %vm886_vm8, %v1134_v11, %v1225_v24  ;;  %v3584_v11 = vsel %vm773_vm6, 0.0, %v1284_v54 }
 0x4db   : > { %v1169_v31 = vpop.permute.xlu0 %1168  ;;  %v1285_v60 = vrot.slane %v3565_v41, 7 }
 0x4dc   : > { %v1193_v37 = vsel %vm886_vm8, %v2582_v21, %v1169_v31  ;;  %v2594_v31 = vpop.eup %2593 }
 0x4dd   : > { %v1161_v38 = vpop.permute.xlu1 %1160  ;;  %v1249_v57 = vrot.slane %v1193_v37, 7  ;;  %v1305_v45 = vmul.f32 %v1297_v22, %v1193_v37 }
 0x4de   : > { %v1191_v48 = vsel %vm886_vm8, %v2584_v33, %v1161_v38  ;;  %v3589_v33 = vsel %vm773_vm6, 0.0, %v1285_v60 }
 0x4df   : > { %v1247_v49 = vrot.slane %v1191_v48, 7  ;;  %v1303_v51 = vmul.f32 %v1295_v29, %v1191_v48  ;;  %v1265_v55 = vsel %vm773_vm6, 1.0, %v1249_v57  ;;  %v1313_v58 = vadd.f32 %v1305_v45, %v1233_v2  ;;  %v3593_v57 = vpop.eup %2595 }
 0x4e0   : > { %v1321_v61 = vmul.f32 %v1265_v55, %v1193_v37 }
 0x4e1   : > { %v1263_v0 = vsel %vm773_vm6, 1.0, %v1247_v49  ;;  %v1311_v7 = vadd.f32 %v1303_v51, %v1231_v1  ;;  %v1165_v9 = vpop.permute.xlu1 %1164  ;;  %v1369_v13 = vrot.slane %v1313_v58, 6  ;;  %v1299_v1 = vsel %vm773_vm6, 0.0, %v1283_v56  ;;  %v3598_v56 = vpop.eup %2597 }
 0x4e2   : > { %v1319_v40 = vmul.f32 %v1263_v0, %v1191_v48  ;;  %v1192_v14 = vsel %vm886_vm8, %v2586_v59, %v1165_v9  ;;  %v1337_v15 = vrot.slane %v1321_v61, 6  ;;  %v3603_v9 = vpop.eup %2599 }
 0x4e3   : > { %v1367_v2 = vrot.slane %v1311_v7, 6  ;;  %v1248_v20 = vrot.slane %v1192_v14, 7  ;;  %v1304_v24 = vmul.f32 %v1296_v12, %v1192_v14  ;;  %v1385_v21 = vsel %vm757_vm5, 0.0, %v1369_v13  ;;  %v1177_v29 = vpop.permute.xlu0 %1176 }
 0x4e4   : > { %v1335_v22 = vrot.slane %v1319_v40, 6  ;;  %v1393_v34 = vmul.f32 %v1385_v21, %v1321_v61  ;;  %v1353_v45 = vsel %vm757_vm5, 1.0, %v1337_v15  ;;  %v1195_v0 = vsel %vm886_vm8, %v2592_v25, %v1177_v29 }
 0x4e5   : > { %v1383_v37 = vsel %vm757_vm5, 0.0, %v1367_v2  ;;  %v1264_v38 = vsel %vm773_vm6, 1.0, %v1248_v20  ;;  %v1312_v51 = vadd.f32 %v1304_v24, %v3533_v27  ;;  %v1229_v54 = vpop.permute.xlu1 %1228  ;;  %v1251_v2 = vrot.slane %v1195_v0, 7 }
 0x4e6   : > { %v1351_v48 = vsel %vm757_vm5, 1.0, %v1335_v22  ;;  %v1391_v49 = vmul.f32 %v1383_v37, %v1319_v40  ;;  %v3600_v55 = vadd.f32 %v1393_v34, %v1313_v58  ;;  %v1320_v60 = vmul.f32 %v1264_v38, %v1192_v14 }
 0x4e7   : > { %v1407_v59 = vmul.f32 %v1351_v48, %v1319_v40  ;;  %v1368_v13 = vrot.slane %v1312_v51, 6  ;;  %v1307_v15 = vmul.f32 %v1299_v1, %v1195_v0  ;;  %v1213_v20 = vpop.permute.xlu0 %1212  ;;  %v3605_v21 = vmul.f32 %v1353_v45, %v1321_v61 }
 0x4e8   : > { %v1399_v12 = vadd.f32 %v1391_v49, %v1311_v7  ;;  %v1336_v22 = vrot.slane %v1320_v60, 6  ;;  %v3609_v27 = vsel %vm886_vm8, %v3525_v23, %v1229_v54  ;;  %v1234_v58 = vsel %vm886_vm8, %v3528_v6, %v1213_v20 }
 0x4e9   : > { %v1458_v40 = vrot.slane %v3600_v55, 4  ;;  %v1384_v14 = vsel %vm757_vm5, 0.0, %v1368_v13  ;;  %v1267_v7 = vsel %vm773_vm6, 1.0, %v1251_v2  ;;  %v1315_v24 = vadd.f32 %v1307_v15, %v3561_v36 }
 0x4ea   : > { %v1456_v25 = vrot.slane %v1399_v12, 4  ;;  %v1352_v61 = vsel %vm757_vm5, 1.0, %v1336_v22  ;;  %v1392_v1 = vmul.f32 %v1384_v14, %v1320_v60  ;;  %v1323_v29 = vmul.f32 %v1267_v7, %v1195_v0 }
 0x4eb   : > { %v1371_v34 = vrot.slane %v1315_v24, 6  ;;  %v1286_v23 = vrot.slane %v3609_v27, 7  ;;  %v1282_v37 = vrot.slane %v1234_v58, 7  ;;  %v1173_v38 = vpop.permute.xlu0 %1172  ;;  %v1423_v45 = vrot.slane %v1407_v59, 4 }
 0x4ec   : > { %v1400_v6 = vadd.f32 %v1392_v1, %v1312_v51  ;;  %v1408_v48 = vmul.f32 %v1352_v61, %v1320_v60  ;;  %v1339_v49 = vrot.slane %v1323_v29, 6  ;;  %v1194_v54 = vsel %vm886_vm8, %v2594_v31, %v1173_v38 }
 0x4ed   : > { %v1387_v13 = vsel %vm757_vm5, 0.0, %v1371_v34  ;;  %v1298_v36 = vsel %vm773_vm6, 0.0, %v1282_v37  ;;  %v1250_v2 = vrot.slane %v1194_v54, 7  ;;  %v1440_v15 = vsel %vm1439_vm9, 1.0, %v1423_v45 }
 0x4ee   : > { %v1457_v20 = vrot.slane %v1400_v6, 4  ;;  %v1355_v0 = vsel %vm757_vm5, 1.0, %v1339_v49  ;;  %v1395_v22 = vmul.f32 %v1387_v13, %v1323_v29  ;;  %v1306_v14 = vmul.f32 %v1298_v36, %v1194_v54 }
 0x4ef   : > { %v1411_v7 = vmul.f32 %v1355_v0, %v1323_v29  ;;  %v1266_v53 = vsel %vm773_vm6, 1.0, %v1250_v2  ;;  %v1472_v51 = vsel %vm1439_vm9, 0.0, %v1456_v25  ;;  %v1496_v60 = vmul.f32 %v1440_v15, %v1407_v59 }
 0x4f0   : > { %v1403_v61 = vadd.f32 %v1395_v22, %v1315_v24  ;;  %v1314_v31 = vadd.f32 %v1306_v14, %v1234_v58  ;;  %v1322_v1 = vmul.f32 %v1266_v53, %v1194_v54  ;;  %v1480_v34 = vmul.f32 %v1472_v51, %v1407_v59 }
 0x4f1   : > { %v1427_v38 = vrot.slane %v1411_v7, 4  ;;  %v1545_v45 = vmul.f32 %v1508_v5, %v1496_v60  ;;  %v1424_v18 = vrot.slane %v1408_v48, 4  ;;  %v1473_v49 = vsel %vm1439_vm9, 0.0, %v1457_v20 }
 0x4f2   : > { %v1631_v37 = vpop.permute.xlu1 %1630  ;;  %v1460_v13 = vrot.slane %v1403_v61, 4  ;;  %v1338_v29 = vrot.slane %v1322_v1, 6  ;;  %v1370_v36 = vrot.slane %v1314_v31, 6  ;;  %v1488_v2 = vadd.f32 %v1480_v34, %v1399_v12 }
 0x4f3   : > { %v1444_v25 = vsel %vm1439_vm9, 1.0, %v1427_v38  ;;  %v1441_v24 = vsel %vm1439_vm9, 1.0, %v1424_v18  ;;  %v1481_v58 = vmul.f32 %v1473_v49, %v1408_v48  ;;  %v1425_v53 = vrot.slane %v3605_v21, 4 }
 0x4f4   : > { %v1354_v59 = vsel %vm757_vm5, 1.0, %v1338_v29  ;;  %v1386_v54 = vsel %vm757_vm5, 0.0, %v1370_v36  ;;  %v1476_v46 = vsel %vm1439_vm9, 0.0, %v1460_v13  ;;  %v1500_v5 = vmul.f32 %v1444_v25, %v1411_v7 }
 0x4f5   : > { %v1394_v15 = vmul.f32 %v1386_v54, %v1322_v1  ;;  %v1410_v20 = vmul.f32 %v1354_v59, %v1322_v1  ;;  %v1484_v0 = vmul.f32 %v1476_v46, %v1411_v7  ;;  %v3636_v14 = vadd.f32 %v1545_v45, %v1488_v2 }
 0x4f6   : > { %v1181_v22 = vpop.permute.xlu1 %1180  ;;  %v1549_v12 = vmul.f32 %v3540_v26, %v1500_v5  ;;  %v1489_v51 = vadd.f32 %v1481_v58, %v1400_v6  ;;  %v1497_v60 = vmul.f32 %v1441_v24, %v1408_v48  ;;  %v1302_v13 = vsel %vm773_vm6, 0.0, %v1286_v23 }
 0x4f7   : > { %v1196_v18 = vsel %vm886_vm8, %v3593_v57, %v1181_v22  ;;  %v1402_v34 = vadd.f32 %v1394_v15, %v1314_v31  ;;  %v1492_v38 = vadd.f32 %v1484_v0, %v1403_v61  ;;  %v1426_v1 = vrot.slane %v1410_v20, 4 }
 0x4f8   : > { %v1252_v49 = vrot.slane %v1196_v18, 7  ;;  %v1308_v29 = vmul.f32 %v3584_v11, %v1196_v18  ;;  %v1568_v36 = vpop.permute.xlu0 %1567  ;;  %v1546_v7 = vmul.f32 %v1512_v39, %v1497_v60  ;;  %v3647_v26 = vsel %vm1439_vm9, 1.0, %v1425_v53 }
 0x4f9   : > { %v1459_v45 = vrot.slane %v1402_v34, 4  ;;  %v3649_v57 = vadd.f32 %v1549_v12, %v1492_v38  ;;  %v1570_v23 = vmul.f32 %v1568_v36, %v3636_v14  ;;  %v1443_v43 = vsel %vm1439_vm9, 1.0, %v1426_v1 }
 0x4fa   : > { %v1268_v6 = vsel %vm773_vm6, 1.0, %v1252_v49  ;;  %v1316_v48 = vadd.f32 %v1308_v29, %v3558_v35  ;;  %v1185_v61 = vpop.permute.xlu1 %1184  ;;  %v1499_v53 = vmul.f32 %v1443_v43, %v1410_v20  ;;  %v3661_v59 = vadd.f32 %v1546_v7, %v1489_v51 }
 0x4fb   : > { %v1324_v11 = vmul.f32 %v1268_v6, %v1196_v18  ;;  %v1197_v31 = vsel %vm886_vm8, %v3598_v56, %v1185_v61  ;;  %v1633_v39 = vmul.f32 %v1631_v37, %v3649_v57  ;;  %1572 = vrot.lane.b32.xlu1 %v1570_v23, %s2997_s22  ;;  %v1475_v35 = vsel %vm1439_vm9, 0.0, %v1459_v45 }
 0x4fc   : > { %v1372_v2 = vrot.slane %v1316_v48, 6  ;;  %v1253_v25 = vrot.slane %v1197_v31, 7  ;;  %v1309_v24 = vmul.f32 %v3589_v33, %v1197_v31  ;;  %v1483_v5 = vmul.f32 %v1475_v35, %v1410_v20 }
 0x4fd   : > { %v1340_v58 = vrot.slane %v1324_v11, 6  ;;  %1635 = vrot.lane.b32.xlu0 %v1633_v39, %s2997_s22 }
 0x4fe   : > { %v1388_v54 = vsel %vm757_vm5, 0.0, %v1372_v2  ;;  %v1269_v56 = vsel %vm773_vm6, 1.0, %v1253_v25  ;;  %v1317_v46 = vadd.f32 %v1309_v24, %v3565_v41  ;;  %v1189_v37 = vpop.permute.xlu1 %1188  ;;  %v1548_v41 = vmul.f32 %v1520_v52, %v1499_v53 }
 0x4ff   : > { %v1356_v33 = vsel %vm757_vm5, 1.0, %v1340_v58  ;;  %v1396_v15 = vmul.f32 %v1388_v54, %v1324_v11  ;;  %v1325_v0 = vmul.f32 %v1269_v56, %v1197_v31  ;;  %v1198_v22 = vsel %vm886_vm8, %v3603_v9, %v1189_v37 }
 0x500   : > { %v1412_v12 = vmul.f32 %v1356_v33, %v1324_v11  ;;  %v1373_v18 = vrot.slane %v1317_v46, 6  ;;  %v1254_v51 = vrot.slane %v1198_v22, 7  ;;  %v1310_v60 = vmul.f32 %v1302_v13, %v1198_v22 }
 0x501   : > { %v1404_v38 = vadd.f32 %v1396_v15, %v1316_v48  ;;  %v1341_v49 = vrot.slane %v1325_v0, 6  ;;  %v1491_v29 = vadd.f32 %v1483_v5, %v1402_v34  ;;  %1672 = vperm.xlu0 %2525, %v3399_v8   ;;  %v1474_v34 = vsel %vm1439_vm9, 0.0, %v1458_v40 }
 0x502   : > { %v1389_v20 = vsel %vm757_vm5, 0.0, %v1373_v18  ;;  %v1428_v36 = vrot.slane %v1412_v12, 4  ;;  %v1270_v1 = vsel %vm773_vm6, 1.0, %v1254_v51  ;;  %v1318_v7 = vadd.f32 %v1310_v60, %v3609_v27  ;;  %v1584_v9 = vpop.permute.xlu1 %1583  ;;  %v2533_v27 = vld [vmem:[%s3890_s25 + $0x18] sm:$0xff]  }
 0x503   : > { %v1461_v45 = vrot.slane %v1404_v38, 4  ;;  %v1357_v13 = vsel %vm757_vm5, 1.0, %v1341_v49  ;;  %v1397_v6 = vmul.f32 %v1389_v20, %v1325_v0  ;;  %v1326_v48 = vmul.f32 %v1270_v1, %v1198_v22  ;;  %2282 = vmatpush3.bf16.msra.mxu0 %v2533_v27  ;;  %v1647_v22 = vpop.permute.xlu0 %1646 }
 0x504   : > { %v1445_v61 = vsel %vm1439_vm9, 1.0, %v1428_v36  ;;  %v1374_v47 = vrot.slane %v1318_v7, 6  ;;  %v3679_v52 = vadd.f32 %v1548_v41, %v1491_v29  ;;  %v1413_v43 = vmul.f32 %v1357_v13, %v1325_v0  ;;  %2283 = vmatprep.subr.bf16.mxu0 %v2984_v16 }
 0x505   : > { %v1405_v8 = vadd.f32 %v1397_v6, %v1317_v46  ;;  %v1477_v11 = vsel %vm1439_vm9, 0.0, %v1461_v45  ;;  %v1501_v23 = vmul.f32 %v1445_v61, %v1412_v12  ;;  %v1342_v31 = vrot.slane %v1326_v48, 6  ;;  %2526 = vset.pattern.permute.xlu0 %v2999_v63  ;;  %v2534_v63 = vld [vmem:[%s3890_s25 + $0x10] sm:$0xff]  }
 0x506   : > { %v1485_v39 = vmul.f32 %v1477_v11, %v1412_v12  ;;  %v1390_v2 = vsel %vm757_vm5, 0.0, %v1374_v47  ;;  %v1695_v25 = vcombine.high %v3636_v14, %v3661_v59  ;;  %v1586_v56 = vmul.f32 %v1584_v9, %v3661_v59 }
 0x507   : > { %v1462_v40 = vrot.slane %v1405_v8, 4  ;;  %v1550_v24 = vmul.f32 %v3551_v32, %v1501_v23  ;;  %v1358_v58 = vsel %vm757_vm5, 1.0, %v1342_v31  ;;  %v1398_v53 = vmul.f32 %v1390_v2, %v1326_v48  ;;  %v1600_v46 = vpop.permute.xlu1 %1599  ;;  %2284 = vmatpush3.bf16.msra.mxu0 %v2534_v63  ;;  %v1616_v61 = vpop.permute.xlu0 %1615  ;;  %v2536_v31 = vld [vmem:[%s3890_s25] sm:$0xff]  }
 0x508   : > { %v1493_v35 = vadd.f32 %v1485_v39, %v1404_v38  ;;  %v1414_v54 = vmul.f32 %v1358_v58, %v1326_v48  ;;  %v1532_v37 = vrot.slane %v3535_v30, %v1073_v28  ;;  %v1482_v32 = vmul.f32 %v1474_v34, %v3605_v21  ;;  %1588 = vrot.lane.b32.xlu1 %v1586_v56, %s2997_s22 }
 0x509   : > { %v1406_v5 = vadd.f32 %v1398_v53, %v1318_v7  ;;  %v1498_v33 = vmul.f32 %v3647_v26, %v3605_v21  ;;  %v3891_v15 = vsub.s32 7, %v3351_v42  ;;  %v1429_v28 = vrot.slane %v1413_v43, 4  ;;  %2285 = vmatprep.subr.bf16.mxu0 %v2984_v16 }
 0x50a   : > { %v3708_v12 = vadd.f32 %v1550_v24, %v1493_v35  ;;  %v1478_v18 = vsel %vm1439_vm9, 0.0, %v1462_v40  ;;  %v1430_v51 = vrot.slane %v1414_v54, 4  ;;  %v1490_v38 = vadd.f32 %v1482_v32, %v3600_v55  ;;  %v2535_v55 = vld [vmem:[%s3890_s25 + $0x8] sm:$0xff]  }
 0x50b   : > { %v1536_v0 = vrot.slane %v3535_v30, %v3891_v15  ;;  %v1463_v60 = vrot.slane %v1406_v5, 4  ;;  %v3892_v21 = vrot.slane %v3535_v30, %v3357_v44  ;;  %v1486_v42 = vmul.f32 %v1478_v18, %v1413_v43  ;;  %v1663_v7 = vpop.permute.xlu1 %1662  ;;  %2286 = vmatpush3.bf16.msra.mxu0 %v2535_v55 }
 0x50c   : > { %v1649_v49 = vmul.f32 %v1647_v22, %v3708_v12  ;;  %v1697_v41 = vcombine.high %v3649_v57, %v3708_v12  ;;  %v1446_v29 = vsel %vm1439_vm9, 1.0, %v1429_v28  ;;  %v1447_v20 = vsel %vm1439_vm9, 1.0, %v1430_v51  ;;  %2287 = vmatprep.subr.bf16.mxu0 %v2984_v16 }
 0x50d   : > { %v1547_v26 = vmul.f32 %v3892_v21, %v1498_v33  ;;  %v1494_v1 = vadd.f32 %v1486_v42, %v1405_v8  ;;  %v1502_v44 = vmul.f32 %v1446_v29, %v1413_v43  ;;  %v1479_v30 = vsel %vm1439_vm9, 0.0, %v1463_v60 }
 0x50e   : > { %1651 = vrot.lane.b32.xlu1 %v1649_v49, %s2997_s22  ;;  %v1487_v9 = vmul.f32 %v1479_v30, %v1414_v54  ;;  %v1503_v45 = vmul.f32 %v1447_v20, %v1414_v54  ;;  %v1705_v27 = vrot.slane %v1695_v25, %v3554_v17  ;;  %v1618_v43 = vmul.f32 %v1616_v61, %v3679_v52 }
 0x50f   : > { %v1555_v36 = vadd.f32 %v1547_v26, %v1490_v38  ;;  %v1551_v48 = vmul.f32 %v1532_v37, %v1502_v44  ;;  %2288 = vmatpush3.bf16.msra.mxu0 %v2536_v31  ;;  %v1719_v58 = vrot.slane %v1697_v41, %v3554_v17  ;;  %v1767_v35 = vmul.f32 %v3577_v10, %v3370_v50  ;;  %v1626_v10 = vpop.permute.xlu0 %1625 }
 0x510   : > { %v1495_v47 = vadd.f32 %v1487_v9, %v1406_v5  ;;  %v1552_v34 = vmul.f32 %v1536_v0, %v1503_v45  ;;  %v1679_v24 = vpop.permute.xlu1 %1678  ;;  %v1768_v37 = vmul.f32 %v3581_v19, %v3377_v62  ;;  %v1628_v28 = vmul.f32 %v1626_v10, %v3649_v57 }
 0x511   : > { %v1696_v13 = vcombine.high %v1555_v36, %v3679_v52  ;;  %v1602_v6 = vmul.f32 %v1600_v46, %v1555_v36  ;;  %v1559_v11 = vadd.f32 %v1551_v48, %v1494_v1 }
 0x512   : > { %v1560_v23 = vadd.f32 %v1552_v34, %v1495_v47 }
 0x513   : > { %v1712_v8 = vrot.slane %v1696_v13, %v3554_v17  ;;  %1604 = vrot.lane.b32.xlu0 %v1602_v6, %s2997_s22  ;;  %v1665_v2 = vmul.f32 %v1663_v7, %v1559_v11  ;;  %v1594_v0 = vpop.permute.xlu0 %1593 }
 0x514   : > { %v1698_v40 = vcombine.high %v1559_v11, %v1560_v23  ;;  %v1681_v25 = vmul.f32 %v1679_v24, %v1560_v23  ;;  %v1596_v42 = vmul.f32 %v1594_v0, %v1555_v36 }
 0x515   : > { %v1727_v39 = vcombine.high %v1705_v27, %v1712_v8  ;;  %1667 = vrot.lane.b32.xlu1 %v1665_v2, %s2997_s22  ;;  %v1563_v5 = vpop.permute.xlu1 %1562  ;;  %v2537_v2 = vld [vmem:[#allocation18 + $0x8] sm:$0xff]  }
 0x516   : > { %v1726_v53 = vrot.slane %v1698_v40, %v3554_v17  ;;  %v1565_v22 = vmul.f32 %v1563_v5, %v3636_v14  ;;  %2294 = vmatpush3.bf16.msra.mxu1 %v2537_v2 }
 0x517   : > { %1620 = vrot.lane.b32.xlu0 %v1618_v43, %s2997_s22  ;;  %v1735_v56 = vrot.slane %v1727_v39, %v3554_v17  ;;  %2295 = vmatprep.subr.bf16.mxu1 %v2984_v16 }
 0x518   : > { %v1728_v54 = vcombine.high %v1719_v58, %v1726_v53 }
 0x519   : > { %1683 = vrot.lane.b32.xlu1 %v1681_v25, %s2997_s22 }
 0x51a   : > { %v1742_v46 = vrot.slane %v1728_v54, %v3554_v17  ;;  %v1578_v32 = vpop.permute.xlu1 %1577 }
 0x51b   : > { %1771 = vrot.lane.b32.xlu0 %v1767_v35, %s2997_s22  ;;  %v1580_v17 = vmul.f32 %v1578_v32, %v3661_v59 }
 0x51c   : > { %v1743_v63 = vcombine.high %v1735_v56, %v1742_v46 }
 0x51d   : > { %1773 = vrot.lane.b32.xlu1 %v1768_v37, %s2997_s22  ;;  %s2244_s22 = sshll.u32 %s3894_s28, 2 }
 0x51e   : > { %1745 = vst [vmem:[#allocation2] sm:$0xff] %v1743_v63  ;;  %v1641_v33 = vpop.permute.xlu1 %1640  ;;  %s2016_s23 = sadd.s32 %s2951_s16, %s2244_s22  ;;  %s2004_s16 = scalar_lea.sflag [#allocation6], %s3281_s1 }
 0x51f   : > { %v1643_v19 = vmul.f32 %v1641_v33, %v3708_v12  ;;  %v2226_v12 = vld [vmem:[#allocation16] ss:$0 sm:$0xff]  ;;  %s2240_s21 = sshll.u32 %s2016_s23, 7 }
 0x520   : > { %v1753_v36 = vmul.f32 %v2226_v12, %v3386_v3  ;;  %v1754_v27 = vmul.f32 %v2226_v12, %v3388_v4  ;;  %s3773_s7 = scalar_lea.hbm %s3895_s2, %s2240_s21 }
 0x523   : > { %v1657_v50 = vpop.permute.xlu1 %1656 }
 0x524   : > { %v1659_v55 = vmul.f32 %v1657_v50, %v1559_v11 }
 0x528   : > { %v1610_v15 = vpop.permute.xlu1 %1609 }
 0x529   : > { %v1612_v44 = vmul.f32 %v1610_v15, %v3679_v52 }
 0x56d   : > { %v1573_v18 = vpop.permute.xlu1 %1572 }
 0x56e   : > { %v1575_v62 = vadd.f32 %v1573_v18, %v1565_v22 }
 0x56f   : > { %v1636_v51 = vpop.permute.xlu0 %1635 }
 0x570   : > { %v1638_v60 = vadd.f32 %v1636_v51, %v1628_v28  ;;  %v1581_v38 = vadd.f32 %v1580_v17, %v1575_v62 }
 0x572   : > { %v1644_v21 = vadd.f32 %v1643_v19, %v1638_v60 }
 0x57a   : > { %v1589_v26 = vpop.permute.xlu1 %1588 }
 0x57b   : > { %v1591_v49 = vadd.f32 %v1589_v26, %v1581_v38 }
 0x57c   : > { %v1673_v41 = vpop.permute.xlu0 %1672 }
 0x57d   : > { %v1597_v29 = vadd.f32 %v1596_v42, %v1591_v49  ;;  %v1675_v45 = vmul.f32 %v1673_v41, %v1560_v23  ;;  %v2538_v23 = vld [vmem:[#allocation18] sm:$0xff]  }
 0x57e   : > { %2296 = vmatpush3.bf16.msra.mxu1 %v2538_v23 }
 0x580   : > { %v1652_v20 = vpop.permute.xlu1 %1651 }
 0x581   : > { %v1654_v14 = vadd.f32 %v1652_v20, %v1644_v21 }
 0x583   : > { %v1660_v57 = vadd.f32 %v1659_v55, %v1654_v14 }
 0x585   : > { %v1605_v1 = vpop.permute.xlu0 %1604 }
 0x586   : > { %v1607_v59 = vadd.f32 %v1605_v1, %v1597_v29 }
 0x587   : > { %v1668_v9 = vpop.permute.xlu1 %1667 }
 0x588   : > { %v1613_v30 = vadd.f32 %v1612_v44, %v1607_v59  ;;  %v1670_v6 = vadd.f32 %v1668_v9, %v1660_v57  ;;  %v3006_v59 = vmov -1.0  }
 0x589   : > { %v1621_v7 = vpop.permute.xlu0 %1620 }
 0x58a   : > { %v1623_v13 = vadd.f32 %v1621_v7, %v1613_v30  ;;  %v1676_v48 = vadd.f32 %v1675_v45, %v1670_v6 }
 0x58b   : > { %v1684_v61 = vpop.permute.xlu1 %1683 }
 0x58c   : > { %v1755_v47 = vadd.f32 %v1753_v36, %v1623_v13  ;;  %v1686_v34 = vadd.f32 %v1684_v61, %v1676_v48 }
 0x58d   : > { %v1772_v8 = vpop.permute.xlu0 %1771 }
 0x58e   : > { %v1756_v11 = vadd.f32 %v1754_v27, %v1686_v34  ;;  %v1777_v52 = vmul.f32 %v1772_v8, %v1755_v47  ;;  %v2232_v8 = vld [vmem:[%s3893_s26] ss:$0 sm:$0xff]  ;;  %s2861_s26 = scalar_lea.vmem %s2860_s10, 512 }
 0x58f   : > { %v1774_v31 = vpop.permute.xlu1 %1773  ;;  %p2863_p5 = scmp.lt.s32.totalorder %s2861_s26, %s2855_s8 }
 0x590   : > { %v1778_v43 = vmul.f32 %v1774_v31, %v1756_v11 }
 0x591   : > { %p2864_p7 = por %p2863_p5, %p2862_p2 }
 0x592   : > { %v1779_v39 = vpack.c.bf16 %v1778_v43, %v1777_v52 }
 0x593   : > { %p2865_p8 = pnand %p2864_p7, %p2858_p0 }
 0x594   : > { %2290 = vmatmul.mubr.msk.bf16.vlgmr.msra.gmra.mxu0 %vm886_vm8, %v1779_v39 }
 0x654   : > { %v1849_v3 = vpop.f32.mrf.mxu0 }
 0x655   : > { %v1858_v40 = vmul.f32 0.70710677, %v1849_v3  ;;  %v1856_v36 = vmul.f32 0.5, %v1849_v3 }
 0x656   : > { %v2291_v24 = vpop.f32.mrf.mxu0 }
 0x657   : > { %v1864_v25 = vand.u32 2147483647, %v1858_v40  ;;  %vm1860_vm10 = vcmp.ge.f32.partialorder %v1858_v40, 0.0 }
 0x658   : > { %v1852_v58 = vpop.f32.mrf.mxu0  ;;  %v1862_v30 = vsel %vm1860_vm10, 1.0, %v3006_v59 }
 0x659   : > { %v1866_v4 = vmul.f32 0.3275911, %v1864_v25  ;;  %v1859_v53 = vmul.f32 0.70710677, %v1852_v58  ;;  %v1892_v63 = vsub.f32 0.0, %v1864_v25  ;;  %v1857_v48 = vmul.f32 0.5, %v1852_v58 }
 0x65a   : > { %v2292_v35 = vpop.f32.mrf.mxu0 }
 0x65b   : > { %v1868_v54 = vadd.f32 1.0, %v1866_v4  ;;  %v1865_v56 = vand.u32 2147483647, %v1859_v53  ;;  %v1894_v5 = vmul.f32 %v1892_v63, %v1864_v25  ;;  %vm1861_vm11 = vcmp.ge.f32.partialorder %v1859_v53, 0.0 }
 0x65c   : > { %v1863_v45 = vsel %vm1861_vm11, 1.0, %v3006_v59 }
 0x65d   : > { %2601 = vrcp.f32 %v1868_v54  ;;  %v1867_v46 = vmul.f32 0.3275911, %v1865_v56  ;;  %v1893_v32 = vsub.f32 0.0, %v1865_v56  ;;  %v1896_v50 = vmul.f32 1.442695, %v1894_v5 }
 0x65f   : > { %v1869_v37 = vadd.f32 1.0, %v1867_v46  ;;  %v1895_v10 = vmul.f32 %v1893_v32, %v1865_v56 }
 0x661   : > { %2603 = vrcp.f32 %v1869_v37  ;;  %v1898_v18 = vmul.f32 1.442695, %v1895_v10  ;;  %v2617_v37 = vld [vmem:[%s3285_s24] sm:$0xff] }
 0x662   : > { %2605 = vpow2.f32 %v1896_v50 }
 0x663   : > { %2607 = vpow2.f32 %v1898_v18 }
 0x66a   : > { %v2602_v33 = vpop.eup %2601 }
 0x66b   : > { %v1874_v16 = vmul.f32 1.0614054, %v2602_v33 }
 0x66d   : > { %v1876_v15 = vadd.f32 -1.4531521, %v1874_v16 }
 0x66e   : > { %v2604_v0 = vpop.eup %2603 }
 0x66f   : > { %v1878_v22 = vmul.f32 %v2602_v33, %v1876_v15  ;;  %v1875_v28 = vmul.f32 1.0614054, %v2604_v0  ;;  %v2606_v20 = vpop.eup %2605 }
 0x670   : > { %v2608_v44 = vpop.eup %2607 }
 0x671   : > { %v1880_v17 = vadd.f32 1.4214138, %v1878_v22  ;;  %v1877_v51 = vadd.f32 -1.4531521, %v1875_v28 }
 0x673   : > { %v1882_v62 = vmul.f32 %v2602_v33, %v1880_v17  ;;  %v1879_v19 = vmul.f32 %v2604_v0, %v1877_v51 }
 0x675   : > { %v1884_v60 = vadd.f32 -0.28449672, %v1882_v62  ;;  %v1881_v38 = vadd.f32 1.4214138, %v1879_v19 }
 0x677   : > { %v1886_v21 = vmul.f32 %v2602_v33, %v1884_v60  ;;  %v1883_v26 = vmul.f32 %v2604_v0, %v1881_v38 }
 0x679   : > { %v1888_v42 = vadd.f32 0.2548296, %v1886_v21  ;;  %v1885_v49 = vadd.f32 -0.28449672, %v1883_v26 }
 0x67b   : > { %v1890_v41 = vmul.f32 %v2602_v33, %v1888_v42  ;;  %v1887_v29 = vmul.f32 %v2604_v0, %v1885_v49  ;;  %v2618_v33 = vld [vmem:[%s3285_s24 + $0x8] sm:$0xff] }
 0x67d   : > { %v1900_v55 = vmul.f32 %v2606_v20, %v1890_v41  ;;  %v1889_v14 = vadd.f32 0.2548296, %v1887_v29 }
 0x67f   : > { %v1902_v1 = vsub.f32 1.0, %v1900_v55  ;;  %v1891_v57 = vmul.f32 %v2604_v0, %v1889_v14 }
 0x681   : > { %v1904_v7 = vmul.f32 %v1902_v1, %v1862_v30  ;;  %v1901_v9 = vmul.f32 %v2608_v44, %v1891_v57 }
 0x683   : > { %v1903_v12 = vsub.f32 1.0, %v1901_v9  ;;  %v1906_v13 = vadd.f32 1.0, %v1904_v7 }
 0x685   : > { %v1905_v6 = vmul.f32 %v1903_v12, %v1863_v45  ;;  %v1908_v47 = vmul.f32 %v1906_v13, %v1856_v36 }
 0x687   : > { %v1907_v61 = vadd.f32 1.0, %v1905_v6 }
 0x689   : > { %v1909_v34 = vmul.f32 %v1907_v61, %v1857_v48 }
 0x68b   : > { %v1910_v27 = vpack.c.bf16 %v1909_v34, %v1908_v47 }
 0x68d   : > { %2298 = vmatmul.mubr.msk.bf16.vlgmr.msra.gmra.mxu1 %vm619_vm1, %v1910_v27 }
 0x74d   : > { %v1971_v11 = vpop.f32.mrf.mxu1 }
 0x74e   : > { %v1972_v31 = vadd.f32 %v2232_v8, %v1971_v11 }
 0x74f   : > { %v2299_v52 = vpop.f32.mrf.mxu1 }
 0x750   : > { %v1978_v43 = vsub.f32 0.0, %v1972_v31 }
 0x751   : > { %v1974_v39 = vpop.f32.mrf.mxu1 }
 0x752   : > { %v1980_v2 = vmul.f32 1.442695, %v1978_v43  ;;  %v1975_v23 = vadd.f32 %v2232_v8, %v1974_v39 }
 0x753   : > { %v2300_v40 = vpop.f32.mrf.mxu1 }
 0x754   : > { %2609 = vpow2.f32 %v1980_v2  ;;  %v1979_v3 = vsub.f32 0.0, %v1975_v23 }
 0x756   : > { %v1982_v24 = vmul.f32 1.442695, %v1979_v3 }
 0x758   : > { %2611 = vpow2.f32 %v1982_v24 }
 0x761   : > { %v2610_v25 = vpop.eup %2609 }
 0x762   : > { %v1984_v58 = vadd.f32 1.0, %v2610_v25 }
 0x764   : > { %2613 = vrcp.f32 %v1984_v58 }
 0x765   : > { %v2612_v4 = vpop.eup %2611 }
 0x766   : > { %v1985_v53 = vadd.f32 1.0, %v2612_v4 }
 0x768   : > { %2615 = vrcp.f32 %v1985_v53 }
 0x771   : > { %v2614_v35 = vpop.eup %2613 }
 0x772   : > { %1990 = vrot.lane.b32.xlu0 %v2614_v35, %s3007_s4 }
 0x775   : > { %v2616_v54 = vpop.eup %2615 }
 0x776   : > { %1992 = vrot.lane.b32.xlu1 %v2616_v54, %s3007_s4 }
 0x7e4   : > { %v1991_v56 = vpop.permute.xlu0 %1990 }
 0x7e5   : > { %v1996_v46 = vmul.f32 %v1991_v56, %v1972_v31 }
 0x7e7   : > { %v1998_v63 = vadd.f32 %v2617_v37, %v1996_v46 }
 0x7e8   : > { %v1993_v5 = vpop.permute.xlu1 %1992 }
 0x7e9   : > { %2000 = vst.msk [vmem:[%s3307_s12] sm:$0xff] %vm619_vm1, %v1998_v63  ;;  %v1997_v32 = vmul.f32 %v1993_v5, %v1975_v23 }
 0x7eb   : > { %v1999_v16 = vadd.f32 %v2618_v33, %v1997_v32 }
 0x7ed   : > { %2236 = vst.msk [vmem:[%s3307_s12 + $0x8] sm:$0xff] %vm619_vm1, %v1999_v16 }
 0x7ee   : > { %2868 = shalt.err (!%p2865_p8)
}
 0x7ef   : > { %s2869_s24 = scalar_lea.hbm %s3773_s7, 256  ;;  %s2873_s4 = scalar_lea.hbm %s3895_s2, 1024 }
 0x7f0   : > { %p2870_p11 = scmp.ne.s32.totalorder %s3773_s7, %s2869_s24  ;;  %p2874_p3 = scmp.lt.s32.totalorder %s3773_s7, %s3895_s2 }
 0x7f1   : > { %p2875_p9 = scmp.lt.s32.totalorder %s2873_s4, %s2869_s24 }
 0x7f2   : > { %p2871_p1 = pnand %p2870_p11, %p3246_p10 }
 0x7f3   : > { %p2876_p6 = por %p2875_p9, %p2874_p3 }
 0x7f4   : > { %p2872_p4 = pneg %p2871_p1 }
 0x7f6   : > { %p2877_p13 = pnand %p2876_p6, %p2872_p4 }
 0x7f8   : > { %2880 = shalt.err (!%p2877_p13)
}
 0x7f9   : > { %s3009_s21 = smov 128   ;;  %s3010_s17 = smov 256  }
 0x7fa   : > { %s3011_s27 = smov 8  }
 0x7fb   : > { %2335 = dma.vmem_to_hbm [thread:$0]  (%p3246_p10), %s3768_s13, 256, %s3773_s7, %s2004_s16, %s3009_s21, %s3010_s17, %s3011_s27  }
 0x7fc PF: > { %p2387_p0 = scmp.ge.s32.totalorder %s2967_s20, 2  ;;  %s2034_s8 = sand.u32 1, %s2939_s29  }
 0x7fd   : > { %s2035_s9 = scalar_lea.sflag [#allocation6], %s2034_s8 }
 0x7fe   : > { %p2367_p2 = pnand %p2387_p0, %p3253_p12 }
 0x800   : > { %p2368_p5 = pneg %p2367_p2 }
 0x802   : > { %2934 = dma.done.wait (%p2368_p5), %s2035_s9, 256  }
 0x803   : > { %2936 = vsyncadd (%p2368_p5), %s2035_s9, 4294967040  ;;  %s34_s20 = sadd.s32 1, %s2967_s20   ;;  %s3896_s14 = sld [smem:[#allocation27_spill]] }
 0x804   : > { %p31_p7 = scmp.ge.s32.totalorder %s34_s20, 6   ;;  %s3897_s1 = sld [smem:[#allocation28_spill]] }
 0x805   : > { %s3898_s29 = smov %s2943_s30  ;;  %s3899_s30 = smov %s2947_s15 }
 0x806   : > { %s3900_s15 = smov %s3260_s5  ;;  %s3901_s16 = smov %s2959_s18 }
 0x807   : > { %s3902_s17 = smov %s2963_s19  ;;  %33 = sbr.rel (!%p31_p7) target bundleno = 24 (0x18), region = 159 }
 0x809   : > { %s3903_s18 = smov %s3896_s14 }
 0x80a   : > { %s3904_s19 = smov %s3897_s1 }
 0x80c   :  { %2040 = vsyncpa [#allocation5], 1 }
 0x80d   :  { %2042 = vsyncpa [#allocation5 + $0x1], 1 }
 0x80e   :  { %2043 = vsyncpa [#allocation8], 1 }
 0x80f   :  { %2044 = vsyncpa [#allocation11], 1 }
 0x810   :  { %2045 = vsyncpa [#allocation14], 1 }
 0x811   :  { %2046 = vsyncpa [#allocation17], 1 }
 0x812   :  { %2047 = vsyncpa [#allocation6], 1 }
 0x813   :  { %2049 = vsyncpa [#allocation6 + $0x1], 1 }

</bundles_post_ra>
